<compile_context>
chip_gen: v5e
topology: v5e:2x2
jax: 0.10.0
libtpu: 0.0.40
codegen_flags: <defaults>
</compile_context>

<pallas_src>
import functools

import numpy as np
import jax
import jax.numpy as jnp
from jax.experimental import pallas as pl
from jax.experimental.pallas import tpu as pltpu


def _round_up(a, m):
    return ((a + m - 1) // m) * m


def _gru_fused_kernel(T, Bp, HP,
                      x_ref, h0_ref, wih_ref, whh_ref, bgi_ref, bhn_ref, wout_ref,
                      out_ref, hT_ref, hs_ref):
    """Fused GRU recurrence + linear readout; single invocation, all-VMEM.

    Shapes (padded): x (T*Bp, IP) bf16, wih (IP, 3HP) bf16, whh (HP, 3HP) bf16,
    bgi (1, 3HP) f32, bhn (1, HP) f32, h0 (Bp, HP) f32, wout (HP, OP) f32,
    out (T*Bp, OP) f32, hT (Bp, HP) f32, hs scratch (T*Bp, HP) f32.
    """
    # Hoisted input projection for ALL timesteps: one bf16 MXU pass with f32
    # accumulation, off the serial critical path.  Rows are time-major (t*Bp + b).
    gi_all = (jnp.dot(x_ref[...], wih_ref[...], preferred_element_type=jnp.float32)
              + bgi_ref[...])                                   # (T*Bp, 3HP) f32

    whh = whh_ref[...]                                          # (HP, 3HP) bf16, loaded once
    # Hoisted broadcast (JAX does not CSE broadcast_in_dim inside the unroll).
    b_hn = jnp.broadcast_to(bhn_ref[...], (Bp, HP))             # (Bp, HP) f32
    h = h0_ref[...]                                             # (Bp, HP) f32

    # Fully unrolled time loop (T is small and static); only the recurrent matmul
    # + gate math is on the serial critical path.
    for t in range(T):
        gi_t = gi_all[t * Bp:(t + 1) * Bp, :]                   # contiguous, sublane-aligned
        gh = jnp.dot(h.astype(jnp.bfloat16), whh,
                     preferred_element_type=jnp.float32)        # (Bp, 3HP) f32
        # 128-lane-aligned whole-vreg gate slices (gate order [r | z | n]).
        r = jax.nn.sigmoid(gi_t[:, 0:HP] + gh[:, 0:HP])
        z = jax.nn.sigmoid(gi_t[:, HP:2 * HP] + gh[:, HP:2 * HP])
        n = jnp.tanh(gi_t[:, 2 * HP:3 * HP] + r * (gh[:, 2 * HP:3 * HP] + b_hn))
        h = (1.0 - z) * n + z * h
        hs_ref[t * Bp:(t + 1) * Bp, :] = h                      # aligned VMEM store

    # Final hidden state, written exactly once (lane-dense (Bp, HP) tile).
    hT_ref[...] = h.astype(hT_ref.dtype)

    # Fused readout: one (T*Bp, HP)@(HP, OP) MXU pass into a lane-dense output.
    out_ref[...] = jnp.dot(hs_ref[...], wout_ref[...],
                           preferred_element_type=jnp.float32).astype(out_ref.dtype)


def gru_net_forward(x, h, params, washout=0):
    """Mirror of GRUNet.forward.  x: (B, T, input_dim), h: (1, B, H)."""
    wih, whh = params["w_ih"], params["w_hh"]      # (3H, I), (3H, H), gate order [r|z|n]
    bih, bhh = params["b_ih"], params["b_hh"]      # (3H,), (3H,)
    w_out = params["w_out"]                        # (H, O)
    B, T, I = x.shape
    H = whh.shape[1]
    O = w_out.shape[1]

    # Padded, hardware-friendly dims: 128-lane gate blocks / outputs, 8-sublane batch.
    HP = max(128, _round_up(H, 128))
    OP = max(128, _round_up(O, 128))
    Bp = max(8, _round_up(B, 8))
    IP = max(8, _round_up(I, 8))

    f32 = jnp.float32

    def gate_pad_cols(w):
        """(rows, 3H) -> (rows, 3HP): each gate block starts at a 128-lane boundary."""
        out = jnp.zeros((w.shape[0], 3 * HP), w.dtype)
        for g in range(3):
            out = out.at[:, g * HP:g * HP + H].set(w[:, g * H:(g + 1) * H])
        return out

    # One-time parameter prep (tiny XLA ops): pre-transposed, gate-padded weights in
    # bf16 (MXU-native) and precombined biases.  b_hh for r/z folds into the hoisted
    # projection; b_hh_n must stay inside the r*(...) term, passed separately.
    wih_pad = jnp.zeros((IP, 3 * HP), f32).at[:I].set(
        gate_pad_cols(wih.T.astype(f32))).astype(jnp.bfloat16)          # (IP, 3HP)
    whh_pad = jnp.zeros((HP, 3 * HP), f32).at[:H].set(
        gate_pad_cols(whh.T.astype(f32))).astype(jnp.bfloat16)          # (HP, 3HP)

    b_gi_small = bih + jnp.concatenate([bhh[:2 * H], jnp.zeros((H,), bhh.dtype)])
    b_gi = gate_pad_cols(b_gi_small.reshape(1, 3 * H).astype(f32))      # (1, 3HP)
    b_hn = jnp.zeros((1, HP), f32).at[:, :H].set(bhh[2 * H:].reshape(1, H))

    h0 = jnp.zeros((Bp, HP), f32).at[:B, :H].set(h[0])                  # padded h0
    w_out_pad = jnp.zeros((HP, OP), f32).at[:H, :O].set(w_out)          # (HP, OP)

    # Time-major, batch/input-padded input: row index = t*Bp + b.
    x_tm = jnp.transpose(x, (1, 0, 2))                                  # (T, B, I)
    x_pad = jnp.zeros((T, Bp, IP), f32).at[:, :B, :I].set(x_tm)
    x2d = x_pad.reshape(T * Bp, IP).astype(jnp.bfloat16)                # (T*Bp, IP)

    kernel = functools.partial(_gru_fused_kernel, T, Bp, HP)
    out_full, hT_full = pl.pallas_call(
        kernel,
        out_shape=(jax.ShapeDtypeStruct((T * Bp, OP), f32),
                   jax.ShapeDtypeStruct((Bp, HP), f32)),
        in_specs=[pl.BlockSpec(memory_space=pltpu.MemorySpace.VMEM)
                  for _ in range(7)],
        out_specs=(pl.BlockSpec(memory_space=pltpu.MemorySpace.VMEM),
                   pl.BlockSpec(memory_space=pltpu.MemorySpace.VMEM)),
        scratch_shapes=[pltpu.VMEM((T * Bp, HP), f32)],
    )(x2d, h0, wih_pad, whh_pad, b_gi, b_hn, w_out_pad)

    # Wrapper-side un-padding, (b, t) reordering and washout (tiny XLA ops on the
    # small logical tensors; keeps the kernel's stores lane-dense and aligned).
    out = jnp.transpose(out_full.reshape(T, Bp, OP)[:, :B, :O],
                        (1, 0, 2)).reshape(B * T, O)[washout:]
    h_T = hT_full[:B, :H].reshape(1, B, H)
    return out, h_T


def gru_net_reference(x, h, params, washout=0):
    """Pure-JAX reference matching PyTorch nn.GRU semantics."""
    wih, whh = params["w_ih"], params["w_hh"]
    bih, bhh = params["b_ih"], params["b_hh"]
    w_out = params["w_out"]
    H = wih.shape[0] // 3

    def step(h_prev, x_t):
        gi = x_t @ wih.T + bih
        gh = h_prev @ whh.T + bhh
        i_r, i_z, i_n = jnp.split(gi, 3, axis=-1)
        h_r, h_z, h_n = jnp.split(gh, 3, axis=-1)
        r = jax.nn.sigmoid(i_r + h_r)
        z = jax.nn.sigmoid(i_z + h_z)
        n = jnp.tanh(i_n + r * h_n)
        h_new = (1.0 - z) * n + z * h_prev
        return h_new, h_new

    h_T, outs = jax.lax.scan(step, h[0], jnp.transpose(x, (1, 0, 2)))
    out = jnp.transpose(outs, (1, 0, 2)).reshape(-1, H)[washout:] @ w_out
    return out, h_T[None]


if __name__ == "__main__":
    B, T, INPUT_DIM, HIDDEN_DIM, OUTPUT_DIM = 2, 8, 4, 32, 8
    WASHOUT = 2

    key = jax.random.PRNGKey(0)
    ks = jax.random.split(key, 6)
    bound = 1.0 / np.sqrt(HIDDEN_DIM)
    params = {
        # nn.GRU params: uniform(-1/sqrt(H), 1/sqrt(H)), gate order [r, z, n]
        "w_ih": jax.random.uniform(ks[0], (3 * HIDDEN_DIM, INPUT_DIM), jnp.float32, -bound, bound),
        "w_hh": jax.random.uniform(ks[1], (3 * HIDDEN_DIM, HIDDEN_DIM), jnp.float32, -bound, bound),
        "b_ih": jax.random.uniform(ks[2], (3 * HIDDEN_DIM,), jnp.float32, -bound, bound),
        "b_hh": jax.random.uniform(ks[3], (3 * HIDDEN_DIM,), jnp.float32, -bound, bound),
        # w_out = torch.rand(H, O)  -> uniform [0, 1)
        "w_out": jax.random.uniform(ks[4], (HIDDEN_DIM, OUTPUT_DIM), jnp.float32, 0.0, 1.0),
    }

    x = jax.random.normal(ks[5], (B, T, INPUT_DIM), jnp.float32)
    h = jnp.zeros((1, B, HIDDEN_DIM), jnp.float32)   # init_hidden(batch_size)

    out, h_T = gru_net_forward(x, h, params, washout=WASHOUT)
    out, h_T = jax.block_until_ready((out, h_T))

    assert out.shape == (B * T - WASHOUT, OUTPUT_DIM), out.shape
    assert h_T.shape == (1, B, HIDDEN_DIM), h_T.shape

    ref_out, ref_h = gru_net_reference(x, h, params, washout=WASHOUT)
    # Tolerance accounts for bf16 MXU operands (f32 accumulation) in the GRU matmuls.
    np.testing.assert_allclose(np.asarray(out), np.asarray(ref_out), atol=1e-2, rtol=1e-2)
    np.testing.assert_allclose(np.asarray(h_T), np.asarray(ref_h), atol=1e-2, rtol=1e-2)

    print("KERNEL_OK")
</pallas_src>

<mosaic_0001>
module attributes {stable_mosaic.version = 11 : i64} {
  func.func @_gru_fused_kernel(%arg0: memref<64x8xbf16, #tpu.memory_space<vmem>>, %arg1: memref<8x128xf32, #tpu.memory_space<vmem>>, %arg2: memref<8x384xbf16, #tpu.memory_space<vmem>>, %arg3: memref<128x384xbf16, #tpu.memory_space<vmem>>, %arg4: memref<1x384xf32, #tpu.memory_space<vmem>>, %arg5: memref<1x128xf32, #tpu.memory_space<vmem>>, %arg6: memref<128x128xf32, #tpu.memory_space<vmem>>, %arg7: memref<64x128xf32, #tpu.memory_space<vmem>>, %arg8: memref<8x128xf32, #tpu.memory_space<vmem>>, %arg9: memref<64x128xf32, #tpu.memory_space<vmem>>) attributes {dimension_semantics = [], scalar_prefetch = 0 : i64, scratch_operands = 1 : i64, tpu.core_type = #tpu.core_type<tc>} {
    %c0 = arith.constant 0 : index
    %c0_0 = arith.constant 0 : index
    %0 = vector.load %arg0[%c0, %c0_0] : memref<64x8xbf16, #tpu.memory_space<vmem>>, vector<64x8xbf16>
    %c0_1 = arith.constant 0 : index
    %c0_2 = arith.constant 0 : index
    %1 = vector.load %arg2[%c0_1, %c0_2] : memref<8x384xbf16, #tpu.memory_space<vmem>>, vector<8x384xbf16>
    %cst = arith.constant dense<0.000000e+00> : vector<64x384xf32>
    %2 = tpu.matmul %0, %1, %cst {dimension_numbers = #tpu.dot_dimension_numbers<[1], [0], [0], [1], [0, 0, 1, 1], [], []>} : vector<64x8xbf16>, vector<8x384xbf16>, vector<64x384xf32> -> vector<64x384xf32>
    %c0_3 = arith.constant 0 : index
    %c0_4 = arith.constant 0 : index
    %3 = vector.load %arg4[%c0_3, %c0_4] : memref<1x384xf32, #tpu.memory_space<vmem>>, vector<1x384xf32>
    %4 = vector.broadcast %3 : vector<1x384xf32> to vector<64x384xf32>
    %5 = arith.addf %2, %4 : vector<64x384xf32>
    %c0_5 = arith.constant 0 : index
    %c0_6 = arith.constant 0 : index
    %6 = vector.load %arg3[%c0_5, %c0_6] : memref<128x384xbf16, #tpu.memory_space<vmem>>, vector<128x384xbf16>
    %c0_7 = arith.constant 0 : index
    %c0_8 = arith.constant 0 : index
    %7 = vector.load %arg5[%c0_7, %c0_8] : memref<1x128xf32, #tpu.memory_space<vmem>>, vector<1x128xf32>
    %8 = vector.shape_cast %7 : vector<1x128xf32> to vector<1x128xf32>
    %9 = vector.broadcast %8 : vector<1x128xf32> to vector<8x128xf32>
    %c0_9 = arith.constant 0 : index
    %c0_10 = arith.constant 0 : index
    %10 = vector.load %arg1[%c0_9, %c0_10] : memref<8x128xf32, #tpu.memory_space<vmem>>, vector<8x128xf32>
    %11 = vector.extract_strided_slice %5 {offsets = [0, 0], sizes = [8, 384], strides = [1, 1]} : vector<64x384xf32> to vector<8x384xf32>
    %12 = arith.truncf %10 : vector<8x128xf32> to vector<8x128xbf16>
    %cst_11 = arith.constant dense<0.000000e+00> : vector<8x384xf32>
    %13 = tpu.matmul %12, %6, %cst_11 {dimension_numbers = #tpu.dot_dimension_numbers<[1], [0], [0], [1], [0, 0, 1, 1], [], []>} : vector<8x128xbf16>, vector<128x384xbf16>, vector<8x384xf32> -> vector<8x384xf32>
    %14 = vector.extract_strided_slice %11 {offsets = [0, 0], sizes = [8, 128], strides = [1, 1]} : vector<8x384xf32> to vector<8x128xf32>
    %15 = vector.extract_strided_slice %13 {offsets = [0, 0], sizes = [8, 128], strides = [1, 1]} : vector<8x384xf32> to vector<8x128xf32>
    %16 = arith.addf %14, %15 : vector<8x128xf32>
    %17 = arith.negf %16 : vector<8x128xf32>
    %18 = math.exp %17 : vector<8x128xf32>
    %cst_12 = arith.constant 1.000000e+00 : f32
    %19 = vector.broadcast %cst_12 : f32 to vector<8x128xf32>
    %20 = arith.addf %19, %18 : vector<8x128xf32>
    %21 = arith.divf %19, %20 : vector<8x128xf32>
    %22 = vector.extract_strided_slice %11 {offsets = [0, 128], sizes = [8, 128], strides = [1, 1]} : vector<8x384xf32> to vector<8x128xf32>
    %23 = vector.extract_strided_slice %13 {offsets = [0, 128], sizes = [8, 128], strides = [1, 1]} : vector<8x384xf32> to vector<8x128xf32>
    %24 = arith.addf %22, %23 : vector<8x128xf32>
    %25 = arith.negf %24 : vector<8x128xf32>
    %26 = math.exp %25 : vector<8x128xf32>
    %cst_13 = arith.constant 1.000000e+00 : f32
    %27 = vector.broadcast %cst_13 : f32 to vector<8x128xf32>
    %28 = arith.addf %27, %26 : vector<8x128xf32>
    %29 = arith.divf %27, %28 : vector<8x128xf32>
    %30 = vector.extract_strided_slice %11 {offsets = [0, 256], sizes = [8, 128], strides = [1, 1]} : vector<8x384xf32> to vector<8x128xf32>
    %31 = vector.extract_strided_slice %13 {offsets = [0, 256], sizes = [8, 128], strides = [1, 1]} : vector<8x384xf32> to vector<8x128xf32>
    %32 = arith.addf %31, %9 : vector<8x128xf32>
    %33 = arith.mulf %21, %32 : vector<8x128xf32>
    %34 = arith.addf %30, %33 : vector<8x128xf32>
    %35 = math.tanh %34 : vector<8x128xf32>
    %cst_14 = arith.constant 1.000000e+00 : f32
    %36 = vector.broadcast %cst_14 : f32 to vector<8x128xf32>
    %37 = arith.subf %36, %29 : vector<8x128xf32>
    %38 = arith.mulf %37, %35 : vector<8x128xf32>
    %39 = arith.mulf %29, %10 : vector<8x128xf32>
    %40 = arith.addf %38, %39 : vector<8x128xf32>
    %c0_15 = arith.constant 0 : index
    %c0_16 = arith.constant 0 : index
    %41 = vector.load %arg9[%c0_15, %c0_16] : memref<64x128xf32, #tpu.memory_space<vmem>>, vector<8x128xf32>
    tpu.vector_store %arg9[%c0_15, %c0_16], %40 {strides = array<i32>} : memref<64x128xf32, #tpu.memory_space<vmem>>, vector<8x128xf32>,
    %42 = vector.extract_strided_slice %5 {offsets = [8, 0], sizes = [8, 384], strides = [1, 1]} : vector<64x384xf32> to vector<8x384xf32>
    %43 = arith.truncf %40 : vector<8x128xf32> to vector<8x128xbf16>
    %cst_17 = arith.constant dense<0.000000e+00> : vector<8x384xf32>
    %44 = tpu.matmul %43, %6, %cst_17 {dimension_numbers = #tpu.dot_dimension_numbers<[1], [0], [0], [1], [0, 0, 1, 1], [], []>} : vector<8x128xbf16>, vector<128x384xbf16>, vector<8x384xf32> -> vector<8x384xf32>
    %45 = vector.extract_strided_slice %42 {offsets = [0, 0], sizes = [8, 128], strides = [1, 1]} : vector<8x384xf32> to vector<8x128xf32>
    %46 = vector.extract_strided_slice %44 {offsets = [0, 0], sizes = [8, 128], strides = [1, 1]} : vector<8x384xf32> to vector<8x128xf32>
    %47 = arith.addf %45, %46 : vector<8x128xf32>
    %48 = arith.negf %47 : vector<8x128xf32>
    %49 = math.exp %48 : vector<8x128xf32>
    %cst_18 = arith.constant 1.000000e+00 : f32
    %50 = vector.broadcast %cst_18 : f32 to vector<8x128xf32>
    %51 = arith.addf %50, %49 : vector<8x128xf32>
    %52 = arith.divf %50, %51 : vector<8x128xf32>
    %53 = vector.extract_strided_slice %42 {offsets = [0, 128], sizes = [8, 128], strides = [1, 1]} : vector<8x384xf32> to vector<8x128xf32>
    %54 = vector.extract_strided_slice %44 {offsets = [0, 128], sizes = [8, 128], strides = [1, 1]} : vector<8x384xf32> to vector<8x128xf32>
    %55 = arith.addf %53, %54 : vector<8x128xf32>
    %56 = arith.negf %55 : vector<8x128xf32>
    %57 = math.exp %56 : vector<8x128xf32>
    %cst_19 = arith.constant 1.000000e+00 : f32
    %58 = vector.broadcast %cst_19 : f32 to vector<8x128xf32>
    %59 = arith.addf %58, %57 : vector<8x128xf32>
    %60 = arith.divf %58, %59 : vector<8x128xf32>
    %61 = vector.extract_strided_slice %42 {offsets = [0, 256], sizes = [8, 128], strides = [1, 1]} : vector<8x384xf32> to vector<8x128xf32>
    %62 = vector.extract_strided_slice %44 {offsets = [0, 256], sizes = [8, 128], strides = [1, 1]} : vector<8x384xf32> to vector<8x128xf32>
    %63 = arith.addf %62, %9 : vector<8x128xf32>
    %64 = arith.mulf %52, %63 : vector<8x128xf32>
    %65 = arith.addf %61, %64 : vector<8x128xf32>
    %66 = math.tanh %65 : vector<8x128xf32>
    %cst_20 = arith.constant 1.000000e+00 : f32
    %67 = vector.broadcast %cst_20 : f32 to vector<8x128xf32>
    %68 = arith.subf %67, %60 : vector<8x128xf32>
    %69 = arith.mulf %68, %66 : vector<8x128xf32>
    %70 = arith.mulf %60, %40 : vector<8x128xf32>
    %71 = arith.addf %69, %70 : vector<8x128xf32>
    %c8 = arith.constant 8 : index
    %c0_21 = arith.constant 0 : index
    %72 = vector.load %arg9[%c8, %c0_21] : memref<64x128xf32, #tpu.memory_space<vmem>>, vector<8x128xf32>
    tpu.vector_store %arg9[%c8, %c0_21], %71 {strides = array<i32>} : memref<64x128xf32, #tpu.memory_space<vmem>>, vector<8x128xf32>,
    %73 = vector.extract_strided_slice %5 {offsets = [16, 0], sizes = [8, 384], strides = [1, 1]} : vector<64x384xf32> to vector<8x384xf32>
    %74 = arith.truncf %71 : vector<8x128xf32> to vector<8x128xbf16>
    %cst_22 = arith.constant dense<0.000000e+00> : vector<8x384xf32>
    %75 = tpu.matmul %74, %6, %cst_22 {dimension_numbers = #tpu.dot_dimension_numbers<[1], [0], [0], [1], [0, 0, 1, 1], [], []>} : vector<8x128xbf16>, vector<128x384xbf16>, vector<8x384xf32> -> vector<8x384xf32>
    %76 = vector.extract_strided_slice %73 {offsets = [0, 0], sizes = [8, 128], strides = [1, 1]} : vector<8x384xf32> to vector<8x128xf32>
    %77 = vector.extract_strided_slice %75 {offsets = [0, 0], sizes = [8, 128], strides = [1, 1]} : vector<8x384xf32> to vector<8x128xf32>
    %78 = arith.addf %76, %77 : vector<8x128xf32>
    %79 = arith.negf %78 : vector<8x128xf32>
    %80 = math.exp %79 : vector<8x128xf32>
    %cst_23 = arith.constant 1.000000e+00 : f32
    %81 = vector.broadcast %cst_23 : f32 to vector<8x128xf32>
    %82 = arith.addf %81, %80 : vector<8x128xf32>
    %83 = arith.divf %81, %82 : vector<8x128xf32>
    %84 = vector.extract_strided_slice %73 {offsets = [0, 128], sizes = [8, 128], strides = [1, 1]} : vector<8x384xf32> to vector<8x128xf32>
    %85 = vector.extract_strided_slice %75 {offsets = [0, 128], sizes = [8, 128], strides = [1, 1]} : vector<8x384xf32> to vector<8x128xf32>
    %86 = arith.addf %84, %85 : vector<8x128xf32>
    %87 = arith.negf %86 : vector<8x128xf32>
    %88 = math.exp %87 : vector<8x128xf32>
    %cst_24 = arith.constant 1.000000e+00 : f32
    %89 = vector.broadcast %cst_24 : f32 to vector<8x128xf32>
    %90 = arith.addf %89, %88 : vector<8x128xf32>
    %91 = arith.divf %89, %90 : vector<8x128xf32>
    %92 = vector.extract_strided_slice %73 {offsets = [0, 256], sizes = [8, 128], strides = [1, 1]} : vector<8x384xf32> to vector<8x128xf32>
    %93 = vector.extract_strided_slice %75 {offsets = [0, 256], sizes = [8, 128], strides = [1, 1]} : vector<8x384xf32> to vector<8x128xf32>
    %94 = arith.addf %93, %9 : vector<8x128xf32>
    %95 = arith.mulf %83, %94 : vector<8x128xf32>
    %96 = arith.addf %92, %95 : vector<8x128xf32>
    %97 = math.tanh %96 : vector<8x128xf32>
    %cst_25 = arith.constant 1.000000e+00 : f32
    %98 = vector.broadcast %cst_25 : f32 to vector<8x128xf32>
    %99 = arith.subf %98, %91 : vector<8x128xf32>
    %100 = arith.mulf %99, %97 : vector<8x128xf32>
    %101 = arith.mulf %91, %71 : vector<8x128xf32>
    %102 = arith.addf %100, %101 : vector<8x128xf32>
    %c16 = arith.constant 16 : index
    %c0_26 = arith.constant 0 : index
    %103 = vector.load %arg9[%c16, %c0_26] : memref<64x128xf32, #tpu.memory_space<vmem>>, vector<8x128xf32>
    tpu.vector_store %arg9[%c16, %c0_26], %102 {strides = array<i32>} : memref<64x128xf32, #tpu.memory_space<vmem>>, vector<8x128xf32>,
    %104 = vector.extract_strided_slice %5 {offsets = [24, 0], sizes = [8, 384], strides = [1, 1]} : vector<64x384xf32> to vector<8x384xf32>
    %105 = arith.truncf %102 : vector<8x128xf32> to vector<8x128xbf16>
    %cst_27 = arith.constant dense<0.000000e+00> : vector<8x384xf32>
    %106 = tpu.matmul %105, %6, %cst_27 {dimension_numbers = #tpu.dot_dimension_numbers<[1], [0], [0], [1], [0, 0, 1, 1], [], []>} : vector<8x128xbf16>, vector<128x384xbf16>, vector<8x384xf32> -> vector<8x384xf32>
    %107 = vector.extract_strided_slice %104 {offsets = [0, 0], sizes = [8, 128], strides = [1, 1]} : vector<8x384xf32> to vector<8x128xf32>
    %108 = vector.extract_strided_slice %106 {offsets = [0, 0], sizes = [8, 128], strides = [1, 1]} : vector<8x384xf32> to vector<8x128xf32>
    %109 = arith.addf %107, %108 : vector<8x128xf32>
    %110 = arith.negf %109 : vector<8x128xf32>
    %111 = math.exp %110 : vector<8x128xf32>
    %cst_28 = arith.constant 1.000000e+00 : f32
    %112 = vector.broadcast %cst_28 : f32 to vector<8x128xf32>
    %113 = arith.addf %112, %111 : vector<8x128xf32>
    %114 = arith.divf %112, %113 : vector<8x128xf32>
    %115 = vector.extract_strided_slice %104 {offsets = [0, 128], sizes = [8, 128], strides = [1, 1]} : vector<8x384xf32> to vector<8x128xf32>
    %116 = vector.extract_strided_slice %106 {offsets = [0, 128], sizes = [8, 128], strides = [1, 1]} : vector<8x384xf32> to vector<8x128xf32>
    %117 = arith.addf %115, %116 : vector<8x128xf32>
    %118 = arith.negf %117 : vector<8x128xf32>
    %119 = math.exp %118 : vector<8x128xf32>
    %cst_29 = arith.constant 1.000000e+00 : f32
    %120 = vector.broadcast %cst_29 : f32 to vector<8x128xf32>
    %121 = arith.addf %120, %119 : vector<8x128xf32>
    %122 = arith.divf %120, %121 : vector<8x128xf32>
    %123 = vector.extract_strided_slice %104 {offsets = [0, 256], sizes = [8, 128], strides = [1, 1]} : vector<8x384xf32> to vector<8x128xf32>
    %124 = vector.extract_strided_slice %106 {offsets = [0, 256], sizes = [8, 128], strides = [1, 1]} : vector<8x384xf32> to vector<8x128xf32>
    %125 = arith.addf %124, %9 : vector<8x128xf32>
    %126 = arith.mulf %114, %125 : vector<8x128xf32>
    %127 = arith.addf %123, %126 : vector<8x128xf32>
    %128 = math.tanh %127 : vector<8x128xf32>
    %cst_30 = arith.constant 1.000000e+00 : f32
    %129 = vector.broadcast %cst_30 : f32 to vector<8x128xf32>
    %130 = arith.subf %129, %122 : vector<8x128xf32>
    %131 = arith.mulf %130, %128 : vector<8x128xf32>
    %132 = arith.mulf %122, %102 : vector<8x128xf32>
    %133 = arith.addf %131, %132 : vector<8x128xf32>
    %c24 = arith.constant 24 : index
    %c0_31 = arith.constant 0 : index
    %134 = vector.load %arg9[%c24, %c0_31] : memref<64x128xf32, #tpu.memory_space<vmem>>, vector<8x128xf32>
    tpu.vector_store %arg9[%c24, %c0_31], %133 {strides = array<i32>} : memref<64x128xf32, #tpu.memory_space<vmem>>, vector<8x128xf32>,
    %135 = vector.extract_strided_slice %5 {offsets = [32, 0], sizes = [8, 384], strides = [1, 1]} : vector<64x384xf32> to vector<8x384xf32>
    %136 = arith.truncf %133 : vector<8x128xf32> to vector<8x128xbf16>
    %cst_32 = arith.constant dense<0.000000e+00> : vector<8x384xf32>
    %137 = tpu.matmul %136, %6, %cst_32 {dimension_numbers = #tpu.dot_dimension_numbers<[1], [0], [0], [1], [0, 0, 1, 1], [], []>} : vector<8x128xbf16>, vector<128x384xbf16>, vector<8x384xf32> -> vector<8x384xf32>
    %138 = vector.extract_strided_slice %135 {offsets = [0, 0], sizes = [8, 128], strides = [1, 1]} : vector<8x384xf32> to vector<8x128xf32>
    %139 = vector.extract_strided_slice %137 {offsets = [0, 0], sizes = [8, 128], strides = [1, 1]} : vector<8x384xf32> to vector<8x128xf32>
    %140 = arith.addf %138, %139 : vector<8x128xf32>
    %141 = arith.negf %140 : vector<8x128xf32>
    %142 = math.exp %141 : vector<8x128xf32>
    %cst_33 = arith.constant 1.000000e+00 : f32
    %143 = vector.broadcast %cst_33 : f32 to vector<8x128xf32>
    %144 = arith.addf %143, %142 : vector<8x128xf32>
    %145 = arith.divf %143, %144 : vector<8x128xf32>
    %146 = vector.extract_strided_slice %135 {offsets = [0, 128], sizes = [8, 128], strides = [1, 1]} : vector<8x384xf32> to vector<8x128xf32>
    %147 = vector.extract_strided_slice %137 {offsets = [0, 128], sizes = [8, 128], strides = [1, 1]} : vector<8x384xf32> to vector<8x128xf32>
    %148 = arith.addf %146, %147 : vector<8x128xf32>
    %149 = arith.negf %148 : vector<8x128xf32>
    %150 = math.exp %149 : vector<8x128xf32>
    %cst_34 = arith.constant 1.000000e+00 : f32
    %151 = vector.broadcast %cst_34 : f32 to vector<8x128xf32>
    %152 = arith.addf %151, %150 : vector<8x128xf32>
    %153 = arith.divf %151, %152 : vector<8x128xf32>
    %154 = vector.extract_strided_slice %135 {offsets = [0, 256], sizes = [8, 128], strides = [1, 1]} : vector<8x384xf32> to vector<8x128xf32>
    %155 = vector.extract_strided_slice %137 {offsets = [0, 256], sizes = [8, 128], strides = [1, 1]} : vector<8x384xf32> to vector<8x128xf32>
    %156 = arith.addf %155, %9 : vector<8x128xf32>
    %157 = arith.mulf %145, %156 : vector<8x128xf32>
    %158 = arith.addf %154, %157 : vector<8x128xf32>
    %159 = math.tanh %158 : vector<8x128xf32>
    %cst_35 = arith.constant 1.000000e+00 : f32
    %160 = vector.broadcast %cst_35 : f32 to vector<8x128xf32>
    %161 = arith.subf %160, %153 : vector<8x128xf32>
    %162 = arith.mulf %161, %159 : vector<8x128xf32>
    %163 = arith.mulf %153, %133 : vector<8x128xf32>
    %164 = arith.addf %162, %163 : vector<8x128xf32>
    %c32 = arith.constant 32 : index
    %c0_36 = arith.constant 0 : index
    %165 = vector.load %arg9[%c32, %c0_36] : memref<64x128xf32, #tpu.memory_space<vmem>>, vector<8x128xf32>
    tpu.vector_store %arg9[%c32, %c0_36], %164 {strides = array<i32>} : memref<64x128xf32, #tpu.memory_space<vmem>>, vector<8x128xf32>,
    %166 = vector.extract_strided_slice %5 {offsets = [40, 0], sizes = [8, 384], strides = [1, 1]} : vector<64x384xf32> to vector<8x384xf32>
    %167 = arith.truncf %164 : vector<8x128xf32> to vector<8x128xbf16>
    %cst_37 = arith.constant dense<0.000000e+00> : vector<8x384xf32>
    %168 = tpu.matmul %167, %6, %cst_37 {dimension_numbers = #tpu.dot_dimension_numbers<[1], [0], [0], [1], [0, 0, 1, 1], [], []>} : vector<8x128xbf16>, vector<128x384xbf16>, vector<8x384xf32> -> vector<8x384xf32>
    %169 = vector.extract_strided_slice %166 {offsets = [0, 0], sizes = [8, 128], strides = [1, 1]} : vector<8x384xf32> to vector<8x128xf32>
    %170 = vector.extract_strided_slice %168 {offsets = [0, 0], sizes = [8, 128], strides = [1, 1]} : vector<8x384xf32> to vector<8x128xf32>
    %171 = arith.addf %169, %170 : vector<8x128xf32>
    %172 = arith.negf %171 : vector<8x128xf32>
    %173 = math.exp %172 : vector<8x128xf32>
    %cst_38 = arith.constant 1.000000e+00 : f32
    %174 = vector.broadcast %cst_38 : f32 to vector<8x128xf32>
    %175 = arith.addf %174, %173 : vector<8x128xf32>
    %176 = arith.divf %174, %175 : vector<8x128xf32>
    %177 = vector.extract_strided_slice %166 {offsets = [0, 128], sizes = [8, 128], strides = [1, 1]} : vector<8x384xf32> to vector<8x128xf32>
    %178 = vector.extract_strided_slice %168 {offsets = [0, 128], sizes = [8, 128], strides = [1, 1]} : vector<8x384xf32> to vector<8x128xf32>
    %179 = arith.addf %177, %178 : vector<8x128xf32>
    %180 = arith.negf %179 : vector<8x128xf32>
    %181 = math.exp %180 : vector<8x128xf32>
    %cst_39 = arith.constant 1.000000e+00 : f32
    %182 = vector.broadcast %cst_39 : f32 to vector<8x128xf32>
    %183 = arith.addf %182, %181 : vector<8x128xf32>
    %184 = arith.divf %182, %183 : vector<8x128xf32>
    %185 = vector.extract_strided_slice %166 {offsets = [0, 256], sizes = [8, 128], strides = [1, 1]} : vector<8x384xf32> to vector<8x128xf32>
    %186 = vector.extract_strided_slice %168 {offsets = [0, 256], sizes = [8, 128], strides = [1, 1]} : vector<8x384xf32> to vector<8x128xf32>
    %187 = arith.addf %186, %9 : vector<8x128xf32>
    %188 = arith.mulf %176, %187 : vector<8x128xf32>
    %189 = arith.addf %185, %188 : vector<8x128xf32>
    %190 = math.tanh %189 : vector<8x128xf32>
    %cst_40 = arith.constant 1.000000e+00 : f32
    %191 = vector.broadcast %cst_40 : f32 to vector<8x128xf32>
    %192 = arith.subf %191, %184 : vector<8x128xf32>
    %193 = arith.mulf %192, %190 : vector<8x128xf32>
    %194 = arith.mulf %184, %164 : vector<8x128xf32>
    %195 = arith.addf %193, %194 : vector<8x128xf32>
    %c40 = arith.constant 40 : index
    %c0_41 = arith.constant 0 : index
    %196 = vector.load %arg9[%c40, %c0_41] : memref<64x128xf32, #tpu.memory_space<vmem>>, vector<8x128xf32>
    tpu.vector_store %arg9[%c40, %c0_41], %195 {strides = array<i32>} : memref<64x128xf32, #tpu.memory_space<vmem>>, vector<8x128xf32>,
    %197 = vector.extract_strided_slice %5 {offsets = [48, 0], sizes = [8, 384], strides = [1, 1]} : vector<64x384xf32> to vector<8x384xf32>
    %198 = arith.truncf %195 : vector<8x128xf32> to vector<8x128xbf16>
    %cst_42 = arith.constant dense<0.000000e+00> : vector<8x384xf32>
    %199 = tpu.matmul %198, %6, %cst_42 {dimension_numbers = #tpu.dot_dimension_numbers<[1], [0], [0], [1], [0, 0, 1, 1], [], []>} : vector<8x128xbf16>, vector<128x384xbf16>, vector<8x384xf32> -> vector<8x384xf32>
    %200 = vector.extract_strided_slice %197 {offsets = [0, 0], sizes = [8, 128], strides = [1, 1]} : vector<8x384xf32> to vector<8x128xf32>
    %201 = vector.extract_strided_slice %199 {offsets = [0, 0], sizes = [8, 128], strides = [1, 1]} : vector<8x384xf32> to vector<8x128xf32>
    %202 = arith.addf %200, %201 : vector<8x128xf32>
    %203 = arith.negf %202 : vector<8x128xf32>
    %204 = math.exp %203 : vector<8x128xf32>
    %cst_43 = arith.constant 1.000000e+00 : f32
    %205 = vector.broadcast %cst_43 : f32 to vector<8x128xf32>
    %206 = arith.addf %205, %204 : vector<8x128xf32>
    %207 = arith.divf %205, %206 : vector<8x128xf32>
    %208 = vector.extract_strided_slice %197 {offsets = [0, 128], sizes = [8, 128], strides = [1, 1]} : vector<8x384xf32> to vector<8x128xf32>
    %209 = vector.extract_strided_slice %199 {offsets = [0, 128], sizes = [8, 128], strides = [1, 1]} : vector<8x384xf32> to vector<8x128xf32>
    %210 = arith.addf %208, %209 : vector<8x128xf32>
    %211 = arith.negf %210 : vector<8x128xf32>
    %212 = math.exp %211 : vector<8x128xf32>
    %cst_44 = arith.constant 1.000000e+00 : f32
    %213 = vector.broadcast %cst_44 : f32 to vector<8x128xf32>
    %214 = arith.addf %213, %212 : vector<8x128xf32>
    %215 = arith.divf %213, %214 : vector<8x128xf32>
    %216 = vector.extract_strided_slice %197 {offsets = [0, 256], sizes = [8, 128], strides = [1, 1]} : vector<8x384xf32> to vector<8x128xf32>
    %217 = vector.extract_strided_slice %199 {offsets = [0, 256], sizes = [8, 128], strides = [1, 1]} : vector<8x384xf32> to vector<8x128xf32>
    %218 = arith.addf %217, %9 : vector<8x128xf32>
    %219 = arith.mulf %207, %218 : vector<8x128xf32>
    %220 = arith.addf %216, %219 : vector<8x128xf32>
    %221 = math.tanh %220 : vector<8x128xf32>
    %cst_45 = arith.constant 1.000000e+00 : f32
    %222 = vector.broadcast %cst_45 : f32 to vector<8x128xf32>
    %223 = arith.subf %222, %215 : vector<8x128xf32>
    %224 = arith.mulf %223, %221 : vector<8x128xf32>
    %225 = arith.mulf %215, %195 : vector<8x128xf32>
    %226 = arith.addf %224, %225 : vector<8x128xf32>
    %c48 = arith.constant 48 : index
    %c0_46 = arith.constant 0 : index
    %227 = vector.load %arg9[%c48, %c0_46] : memref<64x128xf32, #tpu.memory_space<vmem>>, vector<8x128xf32>
    tpu.vector_store %arg9[%c48, %c0_46], %226 {strides = array<i32>} : memref<64x128xf32, #tpu.memory_space<vmem>>, vector<8x128xf32>,
    %228 = vector.extract_strided_slice %5 {offsets = [56, 0], sizes = [8, 384], strides = [1, 1]} : vector<64x384xf32> to vector<8x384xf32>
    %229 = arith.truncf %226 : vector<8x128xf32> to vector<8x128xbf16>
    %cst_47 = arith.constant dense<0.000000e+00> : vector<8x384xf32>
    %230 = tpu.matmul %229, %6, %cst_47 {dimension_numbers = #tpu.dot_dimension_numbers<[1], [0], [0], [1], [0, 0, 1, 1], [], []>} : vector<8x128xbf16>, vector<128x384xbf16>, vector<8x384xf32> -> vector<8x384xf32>
    %231 = vector.extract_strided_slice %228 {offsets = [0, 0], sizes = [8, 128], strides = [1, 1]} : vector<8x384xf32> to vector<8x128xf32>
    %232 = vector.extract_strided_slice %230 {offsets = [0, 0], sizes = [8, 128], strides = [1, 1]} : vector<8x384xf32> to vector<8x128xf32>
    %233 = arith.addf %231, %232 : vector<8x128xf32>
    %234 = arith.negf %233 : vector<8x128xf32>
    %235 = math.exp %234 : vector<8x128xf32>
    %cst_48 = arith.constant 1.000000e+00 : f32
    %236 = vector.broadcast %cst_48 : f32 to vector<8x128xf32>
    %237 = arith.addf %236, %235 : vector<8x128xf32>
    %238 = arith.divf %236, %237 : vector<8x128xf32>
    %239 = vector.extract_strided_slice %228 {offsets = [0, 128], sizes = [8, 128], strides = [1, 1]} : vector<8x384xf32> to vector<8x128xf32>
    %240 = vector.extract_strided_slice %230 {offsets = [0, 128], sizes = [8, 128], strides = [1, 1]} : vector<8x384xf32> to vector<8x128xf32>
    %241 = arith.addf %239, %240 : vector<8x128xf32>
    %242 = arith.negf %241 : vector<8x128xf32>
    %243 = math.exp %242 : vector<8x128xf32>
    %cst_49 = arith.constant 1.000000e+00 : f32
    %244 = vector.broadcast %cst_49 : f32 to vector<8x128xf32>
    %245 = arith.addf %244, %243 : vector<8x128xf32>
    %246 = arith.divf %244, %245 : vector<8x128xf32>
    %247 = vector.extract_strided_slice %228 {offsets = [0, 256], sizes = [8, 128], strides = [1, 1]} : vector<8x384xf32> to vector<8x128xf32>
    %248 = vector.extract_strided_slice %230 {offsets = [0, 256], sizes = [8, 128], strides = [1, 1]} : vector<8x384xf32> to vector<8x128xf32>
    %249 = arith.addf %248, %9 : vector<8x128xf32>
    %250 = arith.mulf %238, %249 : vector<8x128xf32>
    %251 = arith.addf %247, %250 : vector<8x128xf32>
    %252 = math.tanh %251 : vector<8x128xf32>
    %cst_50 = arith.constant 1.000000e+00 : f32
    %253 = vector.broadcast %cst_50 : f32 to vector<8x128xf32>
    %254 = arith.subf %253, %246 : vector<8x128xf32>
    %255 = arith.mulf %254, %252 : vector<8x128xf32>
    %256 = arith.mulf %246, %226 : vector<8x128xf32>
    %257 = arith.addf %255, %256 : vector<8x128xf32>
    %c56 = arith.constant 56 : index
    %c0_51 = arith.constant 0 : index
    %258 = vector.load %arg9[%c56, %c0_51] : memref<64x128xf32, #tpu.memory_space<vmem>>, vector<8x128xf32>
    tpu.vector_store %arg9[%c56, %c0_51], %257 {strides = array<i32>} : memref<64x128xf32, #tpu.memory_space<vmem>>, vector<8x128xf32>,
    %c0_52 = arith.constant 0 : index
    %c0_53 = arith.constant 0 : index
    %259 = vector.load %arg8[%c0_52, %c0_53] : memref<8x128xf32, #tpu.memory_space<vmem>>, vector<8x128xf32>
    tpu.vector_store %arg8[%c0_52, %c0_53], %257 {strides = array<i32>} : memref<8x128xf32, #tpu.memory_space<vmem>>, vector<8x128xf32>,
    %c0_54 = arith.constant 0 : index
    %c0_55 = arith.constant 0 : index
    %260 = vector.load %arg9[%c0_54, %c0_55] : memref<64x128xf32, #tpu.memory_space<vmem>>, vector<64x128xf32>
    %c0_56 = arith.constant 0 : index
    %c0_57 = arith.constant 0 : index
    %261 = vector.load %arg6[%c0_56, %c0_57] : memref<128x128xf32, #tpu.memory_space<vmem>>, vector<128x128xf32>
    %cst_58 = arith.constant dense<0.000000e+00> : vector<64x128xf32>
    %262 = tpu.matmul %260, %261, %cst_58 {dimension_numbers = #tpu.dot_dimension_numbers<[1], [0], [0], [1], [0, 0, 1, 1], [], []>} : vector<64x128xf32>, vector<128x128xf32>, vector<64x128xf32> -> vector<64x128xf32>
    %c0_59 = arith.constant 0 : index
    %c0_60 = arith.constant 0 : index
    %263 = vector.load %arg7[%c0_59, %c0_60] : memref<64x128xf32, #tpu.memory_space<vmem>>, vector<64x128xf32>
    tpu.vector_store %arg7[%c0_59, %c0_60], %262 {strides = array<i32>} : memref<64x128xf32, #tpu.memory_space<vmem>>, vector<64x128xf32>,
    return
  }
}

</mosaic_0001>

<bundles_post_ra>
// kernel: tpu_custom_call.1
= control target key start
LH: loop header
LB: loop body
LE: loop exit
PB: predicated region body
PF: predicated region fallthrough
CT: control target
= control target key end

     0   :  { %14 = vsyncpa [#allocation4], 0  ;;  %s2085_s0 = inlined_call_operand.vmem [shape: bf16[64,8], index: 0, kind: input, shape index: {}]   ;;  %s2086_s1 = inlined_call_operand.vmem [shape: f32[8,128], index: 1, kind: input, shape index: {}]   ;;  %s2087_s2 = inlined_call_operand.vmem [shape: bf16[8,384], index: 2, kind: input, shape index: {}]   ;;  %s2088_s3 = inlined_call_operand.hbm [shape: bf16[128,384], index: 3, kind: input, shape index: {}]   ;;  %s2089_s4 = inlined_call_operand.vmem [shape: f32[1,384], index: 4, kind: input, shape index: {}]   ;;  %s2090_s5 = inlined_call_operand.vmem [shape: f32[1,128], index: 5, kind: input, shape index: {}]   ;;  %s2091_s6 = inlined_call_operand.hbm [shape: f32[128,128], index: 6, kind: input, shape index: {}]   ;;  %s2092_s7 = inlined_call_operand.hbm [shape: f32[64,128], index: 7, kind: output, shape index: {0}]   ;;  %s2093_s8 = inlined_call_operand.hbm [shape: f32[8,128], index: 8, kind: output, shape index: {1}]  }
   0x1   :  { %15 = vsyncpa [#allocation7], 0 }
   0x2   :  { %16 = vsyncpa [#allocation5], 0 }
   0x3   :  { %17 = vsyncpa [#allocation10], 0  ;;  %s28_s29 = sshll.u32 %s2088_s3, 4  ;;  %s1569_s30 = smov [#allocation3]   ;;  %s29_s29 = int_to_ptr.hbm [resolvable:$true] %s28_s29 }
   0x4   :  { %s30_s9 = sshll.u32 %s1569_s30, 4  ;;  %s45_s12 = sshll.u32 %s2091_s6, 4  ;;  %s31_s9 = int_to_ptr.vmem [resolvable:$true] %s30_s9  ;;  %s46_s12 = int_to_ptr.hbm [resolvable:$true] %s45_s12 }
   0x5   :  { %s1570_s13 = smov 192   ;;  %s1571_s14 = smov 12  }
   0x6   :  { %36 = dma.hbm_to_vmem [thread:$0]  %s29_s29, 3072, %s31_s9, [#allocation4], %s1570_s13, %s1570_s13, %s1571_s14  }
   0x7   :  { %s1572_s15 = smov [#allocation6]   ;;  %s1573_s17 = smov 128  }
   0x8   :  { %s47_s16 = sshll.u32 %s1572_s15, 4  ;;  %s1574_s18 = smov 8   ;;  %s48_s16 = int_to_ptr.vmem [resolvable:$true] %s47_s16 }
   0x9   :  { %53 = dma.hbm_to_vmem [thread:$0]  %s46_s12, 2048, %s48_s16, [#allocation7], %s1573_s17, %s1573_s17, %s1574_s18  }
   0xa   :  { %1561 = dma.done.wait [#allocation4], 3072  }
   0xb   :  { %1562 = vsyncadd [#allocation4], 4294964224 }
   0xc   :  { %1563 = dma.done.wait [#allocation7], 2048  }
   0xd   :  { %1564 = vsyncadd [#allocation7], 4294965248  ;;  %v72_v0 = vld [vmem:[%s2087_s2 + $0x8] sm:$0xf]  ;;  %v1372_v2 = vld [vmem:[#allocation3 + $0xb0] sm:$0xf0] }
   0xe   :  { %v1320_v1 = vld [vmem:[#allocation3 + $0xa8] sm:$0xf]  ;;  %v105_v3 = vunpack.c.l.b16 %v72_v0  ;;  %v1637_v4 = vld [vmem:[%s2087_s2] sm:$0xff]  ;;  %vm122_vm0 = vcmask 1043456   ;;  %v1308_v9 = vld [vmem:[#allocation3 + $0x90] sm:$0xf] }
   0xf   :  { %v103_v5 = vunpack.c.l.b16 %v1637_v4  ;;  %v1640_v7 = vor.u32 %v1372_v2, %v1320_v1  ;;  %v1369_v10 = vld [vmem:[#allocation3 + $0x98] sm:$0xf0]  ;;  %v1646_v12 = vld [vmem:[%s2085_s0 + $0x10] sm:$0xff]  ;;  %vm109_vm1 = vcmask 64512   ;;  %v1652_v14 = vld [vmem:[%s2085_s0] sm:$0xff]  ;;  %v104_v56 = vunpack.c.h.b16 %v1637_v4  ;;  %s1190_s14 = sshll.u32 %s2093_s8, 4  ;;  %s1191_s14 = int_to_ptr.hbm [resolvable:$true] %s1190_s14 }
  0x10   :  { %v108_v6 = vpack.c.b16 %v105_v3, %v105_v3  ;;  %v1328_v15 = vld [vmem:[#allocation3 + $0xb0] sm:$0xf]  ;;  %v1373_v16 = vld [vmem:[#allocation3 + $0xb8] sm:$0xf0]  ;;  %v1655_v17 = vor.u32 %v1369_v10, %v1308_v9  ;;  %v1296_v18 = vld [vmem:[#allocation3 + $0x78] sm:$0xf] }
  0x11   :  { %v106_v8 = vpack.c.b16 %v103_v5, %v103_v5  ;;  %v1657_v19 = vor.u32 %v1373_v16, %v1328_v15  ;;  %v1366_v20 = vld [vmem:[#allocation3 + $0x80] sm:$0xf0]  ;;  %v1371_v21 = vld [vmem:[#allocation3 + $0xac] sm:$0xf]  ;;  %v1322_v22 = vld [vmem:[#allocation3 + $0xb4] sm:$0xf0]  ;;  %v107_v59 = vpack.c.b16 %v104_v56, %v104_v56 }
  0x12   :  { %v130_v11 = vsel %vm122_vm0, %v108_v6, 0  ;;  %v1662_v23 = vor.u32 %v1371_v21, %v1322_v22  ;;  %v1316_v24 = vld [vmem:[#allocation3 + $0x98] sm:$0xf]  ;;  %v1370_v25 = vld [vmem:[#allocation3 + $0xa0] sm:$0xf0]  ;;  %v1671_v29 = vor.u32 %v1366_v20, %v1296_v18  ;;  %v1700_v51 = vld [vmem:[%s2085_s0 + $0x8] sm:$0xff] }
  0x13   :  { %1374 = vmatpush.bf16.msra.mxu3 %v130_v11  ;;  %v124_v13 = vsel %vm122_vm0, %v106_v8, 0  ;;  %197 = vmatpush.bf16.msra.mxu2 %v130_v11  ;;  %v1666_v26 = vor.u32 %v1370_v25, %v1316_v24  ;;  %v1368_v27 = vld [vmem:[#allocation3 + $0x94] sm:$0xf]  ;;  %v1310_v28 = vld [vmem:[#allocation3 + $0x9c] sm:$0xf0]  ;;  %v1693_v49 = vld [vmem:[%s2085_s0 + $0x18] sm:$0xff] }
  0x14   :  { %139 = vmatpush.bf16.msra.mxu0 %v124_v13  ;;  %v1284_v30 = vld [vmem:[#allocation3 + $0x60] sm:$0xf]  ;;  %v1363_v31 = vld [vmem:[#allocation3 + $0x68] sm:$0xf0]  ;;  %v1675_v34 = vor.u32 %v1368_v27, %v1310_v28  ;;  %v1365_v36 = vld [vmem:[#allocation3 + $0x7c] sm:$0xf] }
  0x15   :  { %v1304_v32 = vld [vmem:[#allocation3 + $0x80] sm:$0xf]  ;;  %v1367_v33 = vld [vmem:[#allocation3 + $0x88] sm:$0xf0]  ;;  %v1298_v37 = vld [vmem:[#allocation3 + $0x84] sm:$0xf0]  ;;  %v1680_v38 = vor.u32 %v1363_v31, %v1284_v30 }
  0x16   :  { %1232 = vmatmul.msk.bf16.vlgmr.msra.gmra.mxu3 %vm109_vm1, %v1646_v12  ;;  %1230 = vmatmul.msk.bf16.vlgmr.msra.gmra.mxu2 %vm109_vm1, %v1652_v14  ;;  %v1677_v35 = vor.u32 %v1367_v33, %v1304_v32  ;;  %v1272_v39 = vld [vmem:[#allocation3 + $0x48] sm:$0xf]  ;;  %v1360_v40 = vld [vmem:[#allocation3 + $0x50] sm:$0xf0]  ;;  %v1683_v41 = vor.u32 %v1365_v36, %v1298_v37  ;;  %v1260_v43 = vld [vmem:[#allocation3 + $0x30] sm:$0xf] }
  0x17   :  { %385 = vmatpush.bf16.msrb.mxu3 %v1640_v7  ;;  %1222 = vmatmul.msk.bf16.vlgmr.msra.gmra.mxu0 %vm109_vm1, %v1652_v14  ;;  %v1687_v42 = vor.u32 %v1360_v40, %v1272_v39  ;;  %v1362_v44 = vld [vmem:[#allocation3 + $0x64] sm:$0xf]  ;;  %v1286_v45 = vld [vmem:[#allocation3 + $0x6c] sm:$0xf0]  ;;  %v1357_v46 = vld [vmem:[#allocation3 + $0x38] sm:$0xf0] }
  0x18   :  { %411 = vmatpush.bf16.msrb.mxu0 %v1657_v19  ;;  %487 = vmatpush.bf16.msrb.mxu2 %v1662_v23  ;;  %v1292_v47 = vld [vmem:[#allocation3 + $0x68] sm:$0xf]  ;;  %v1364_v48 = vld [vmem:[#allocation3 + $0x70] sm:$0xf0]  ;;  %v1702_v52 = vor.u32 %v1362_v44, %v1286_v45  ;;  %v1705_v53 = vor.u32 %v1357_v46, %v1260_v43  ;;  %v1359_v54 = vld [vmem:[#allocation3 + $0x4c] sm:$0xf] }
  0x19   :  { %v1695_v50 = vor.u32 %v1364_v48, %v1292_v47  ;;  %v1274_v55 = vld [vmem:[#allocation3 + $0x54] sm:$0xf0]  ;;  %v1354_v58 = vld [vmem:[#allocation3 + $0x20] sm:$0xf0]  ;;  %v1280_v60 = vld [vmem:[#allocation3 + $0x50] sm:$0xf] }
  0x1a   :  { %v1248_v57 = vld [vmem:[#allocation3 + $0x18] sm:$0xf]  ;;  %v1714_v61 = vor.u32 %v1359_v54, %v1274_v55  ;;  %v1361_v62 = vld [vmem:[#allocation3 + $0x58] sm:$0xf0]  ;;  %v1356_v0 = vld [vmem:[#allocation3 + $0x34] sm:$0xf] }
  0x1b   :  { %386 = vmatpush.bf16.msrb.mxu3 %v1655_v17  ;;  %v1719_v63 = vor.u32 %v1354_v58, %v1248_v57  ;;  %v1262_v1 = vld [vmem:[#allocation3 + $0x3c] sm:$0xf0]  ;;  %v127_v2 = vsel %vm122_vm0, %v107_v59, 0  ;;  %v1722_v3 = vor.u32 %v1361_v62, %v1280_v60  ;;  %v1351_v5 = vld [vmem:[#allocation3 + $0x8] sm:$0xf0]  ;;  %s1576_s15 = smov [#allocation8]  }
  0x1c   :  { %412 = vmatpush.bf16.msrb.mxu0 %v1666_v26  ;;  %488 = vmatpush.bf16.msrb.mxu2 %v1675_v34  ;;  %v1236_v4 = vld [vmem:[#allocation3] sm:$0xf]  ;;  %v1268_v6 = vld [vmem:[#allocation3 + $0x38] sm:$0xf]  ;;  %v1358_v8 = vld [vmem:[#allocation3 + $0x40] sm:$0xf0]  ;;  %v1727_v9 = vor.u32 %v1356_v0, %v1262_v1 }
  0x1d   :  { %168 = vmatpush.bf16.msra.mxu1 %v127_v2  ;;  %v1729_v10 = vor.u32 %v1358_v8, %v1268_v6  ;;  %v1732_v11 = vor.u32 %v1351_v5, %v1236_v4  ;;  %v1353_v13 = vld [vmem:[#allocation3 + $0x1c] sm:$0xf]  ;;  %v1250_v15 = vld [vmem:[#allocation3 + $0x24] sm:$0xf0]  ;;  %v1256_v16 = vld [vmem:[#allocation3 + $0x20] sm:$0xf] }
  0x1e   :  { %v1355_v18 = vld [vmem:[#allocation3 + $0x28] sm:$0xf0]  ;;  %v1742_v20 = vld [vmem:[%s2086_s1] sm:$0xff]  ;;  %v1744_v21 = vor.u32 %v1353_v13, %v1250_v15  ;;  %v1244_v25 = vld [vmem:[#allocation3 + $0x8] sm:$0xf]  ;;  %s1174_s16 = sshll.u32 %s1576_s15, 4  ;;  %s1175_s16 = int_to_ptr.vmem [resolvable:$true] %s1174_s16 }
  0x1f   :  { %387 = vmatpush.bf16.msrb.mxu3 %v1671_v29  ;;  %v1350_v22 = vld [vmem:[#allocation3 + $0x4] sm:$0xf]  ;;  %v1746_v24 = vor.u32 %v1355_v18, %v1256_v16  ;;  %v1352_v27 = vld [vmem:[#allocation3 + $0x10] sm:$0xf0]  ;;  %v256_v28 = vpack.c.bf16 %v1742_v20, %v1742_v20  ;;  %v73_v32 = vld [vmem:[%s2089_s4] sm:$0x7] }
  0x20   :  { %413 = vmatpush.bf16.msrb.mxu0 %v1677_v35  ;;  %489 = vmatpush.bf16.msrb.mxu2 %v1683_v41  ;;  %v1754_v30 = vor.u32 %v1352_v27, %v1244_v25  ;;  %v75_v33 = vperm.slane %v73_v32, 0  ;;  %v1854_v4 = vperm.slane %v73_v32, 1  ;;  %s1176_s6 = sshll.u32 %s2092_s7, 4  ;;  %s1177_s6 = int_to_ptr.hbm [resolvable:$true] %s1176_s6 }
  0x21   :  { %474 = vmatpush.bf16.msrb.mxu1 %v1640_v7 }
  0x22   :  { %1226 = vmatmul.msk.bf16.vlgmr.msra.gmra.mxu1 %vm109_vm1, %v1652_v14  ;;  %v1238_v14 = vld [vmem:[#allocation3 + $0xc] sm:$0xf0] }
  0x23   :  { %388 = vmatpush.bf16.msrb.mxu3 %v1680_v38  ;;  %v1757_v31 = vor.u32 %v1350_v22, %v1238_v14 }
  0x24   :  { %414 = vmatpush.bf16.msrb.mxu0 %v1695_v50  ;;  %490 = vmatpush.bf16.msrb.mxu2 %v1702_v52 }
  0x25   :  { %475 = vmatpush.bf16.msrb.mxu1 %v1655_v17 }
  0x26   :  { %1233 = vmatmul.msk.bf16.gmra.mxu3 %vm109_vm1, %v1693_v49  ;;  %1231 = vmatmul.msk.bf16.gmra.mxu2 %vm109_vm1, %v1700_v51 }
  0x27   :  { %389 = vmatpush.bf16.msrb.mxu3 %v1687_v42  ;;  %1223 = vmatmul.msk.bf16.gmra.mxu0 %vm109_vm1, %v1700_v51 }
  0x28   :  { %491 = vmatpush.bf16.msrb.mxu2 %v1714_v61  ;;  %415 = vmatpush.bf16.msrb.mxu0 %v1722_v3 }
  0x29   :  { %476 = vmatpush.bf16.msrb.mxu1 %v1671_v29 }
  0x2b   :  { %390 = vmatpush.bf16.msrb.mxu3 %v1705_v53 }
  0x2c   :  { %492 = vmatpush.bf16.msrb.mxu2 %v1727_v9  ;;  %416 = vmatpush.bf16.msrb.mxu0 %v1729_v10 }
  0x2d   :  { %477 = vmatpush.bf16.msrb.mxu1 %v1680_v38 }
  0x2f   :  { %391 = vmatpush.bf16.msrb.mxu3 %v1719_v63 }
  0x30   :  { %493 = vmatpush.bf16.msrb.mxu2 %v1744_v21  ;;  %417 = vmatpush.bf16.msrb.mxu0 %v1746_v24 }
  0x31   :  { %478 = vmatpush.bf16.msrb.mxu1 %v1687_v42 }
  0x32   :  { %1227 = vmatmul.msk.bf16.gmra.mxu1 %vm109_vm1, %v1700_v51 }
  0x33   :  { %392 = vmatpush.bf16.msrb.mxu3 %v1732_v11 }
  0x34   :  { %494 = vmatpush.bf16.msrb.mxu2 %v1757_v31  ;;  %418 = vmatpush.bf16.msrb.mxu0 %v1754_v30 }
  0x35   :  { %479 = vmatpush.bf16.msrb.mxu1 %v1705_v53 }
  0x36   :  { %393 = vmatmul.bf16.vlgmr.msrb.gmra.mxu3 %v256_v28 }
  0x37   :  { %398 = vmatpush.bf16.msra.mxu3 %v1662_v23  ;;  %1224 = vmatmul.msk.bf16.gmra.mxu0 %vm109_vm1, %v1646_v12 }
  0x38   :  { %563 = vmatpush.bf16.msra.mxu0 %v1640_v7  ;;  %589 = vmatpush.bf16.msra.mxu2 %v1657_v19 }
  0x39   :  { %480 = vmatpush.bf16.msrb.mxu1 %v1719_v63 }
  0x3b   :  { %399 = vmatpush.bf16.msra.mxu3 %v1675_v34 }
  0x3c   :  { %564 = vmatpush.bf16.msra.mxu0 %v1655_v17  ;;  %590 = vmatpush.bf16.msra.mxu2 %v1666_v26 }
  0x3d   :  { %481 = vmatpush.bf16.msrb.mxu1 %v1732_v11 }
  0x3f   :  { %400 = vmatpush.bf16.msra.mxu3 %v1683_v41 }
  0x40   :  { %565 = vmatpush.bf16.msra.mxu0 %v1671_v29  ;;  %591 = vmatpush.bf16.msra.mxu2 %v1677_v35 }
  0x41   :  { %576 = vmatpush.bf16.msra.mxu1 %v1662_v23 }
  0x42   :  { %1228 = vmatmul.msk.bf16.gmra.mxu1 %vm109_vm1, %v1646_v12 }
  0x43   :  { %401 = vmatpush.bf16.msra.mxu3 %v1702_v52 }
  0x44   :  { %566 = vmatpush.bf16.msra.mxu0 %v1680_v38  ;;  %592 = vmatpush.bf16.msra.mxu2 %v1695_v50 }
  0x45   :  { %577 = vmatpush.bf16.msra.mxu1 %v1675_v34 }
  0x47   :  { %402 = vmatpush.bf16.msra.mxu3 %v1714_v61  ;;  %1225 = vmatmul.msk.bf16.gmra.mxu0 %vm109_vm1, %v1693_v49 }
  0x48   :  { %567 = vmatpush.bf16.msra.mxu0 %v1687_v42  ;;  %593 = vmatpush.bf16.msra.mxu2 %v1722_v3 }
  0x49   :  { %578 = vmatpush.bf16.msra.mxu1 %v1683_v41 }
  0x4b   :  { %403 = vmatpush.bf16.msra.mxu3 %v1727_v9 }
  0x4c   :  { %568 = vmatpush.bf16.msra.mxu0 %v1705_v53  ;;  %594 = vmatpush.bf16.msra.mxu2 %v1729_v10 }
  0x4d   :  { %579 = vmatpush.bf16.msra.mxu1 %v1702_v52 }
  0x4f   :  { %404 = vmatpush.bf16.msra.mxu3 %v1744_v21 }
  0x50   :  { %569 = vmatpush.bf16.msra.mxu0 %v1719_v63  ;;  %595 = vmatpush.bf16.msra.mxu2 %v1746_v24 }
  0x51   :  { %580 = vmatpush.bf16.msra.mxu1 %v1714_v61 }
  0x52   :  { %1229 = vmatmul.msk.bf16.gmra.mxu1 %vm109_vm1, %v1693_v49 }
  0x53   :  { %405 = vmatpush.bf16.msra.mxu3 %v1757_v31 }
  0x54   :  { %570 = vmatpush.bf16.msra.mxu0 %v1732_v11  ;;  %596 = vmatpush.bf16.msra.mxu2 %v1754_v30 }
  0x55   :  { %581 = vmatpush.bf16.msra.mxu1 %v1727_v9 }
  0x56   :  { %406 = vmatmul.bf16.vlgmr.msra.gmra.mxu3 %v256_v28 }
  0x57   :  { %500 = vmatpush.bf16.msrb.mxu3 %v1657_v19  ;;  %419 = vmatmul.bf16.vlgmr.msrb.gmra.mxu0 %v256_v28 }
  0x58   :  { %665 = vmatpush.bf16.msrb.mxu0 %v1662_v23 }
  0x59   :  { %582 = vmatpush.bf16.msra.mxu1 %v1744_v21 }
  0x5b   :  { %501 = vmatpush.bf16.msrb.mxu3 %v1666_v26 }
  0x5c   :  { %666 = vmatpush.bf16.msrb.mxu0 %v1675_v34 }
  0x5d   :  { %583 = vmatpush.bf16.msra.mxu1 %v1757_v31 }
  0x5f   :  { %502 = vmatpush.bf16.msrb.mxu3 %v1677_v35 }
  0x60   :  { %667 = vmatpush.bf16.msrb.mxu0 %v1683_v41 }
  0x63   :  { %503 = vmatpush.bf16.msrb.mxu3 %v1695_v50 }
  0x64   :  { %668 = vmatpush.bf16.msrb.mxu0 %v1702_v52 }
  0x67   :  { %504 = vmatpush.bf16.msrb.mxu3 %v1722_v3 }
  0x68   :  { %669 = vmatpush.bf16.msrb.mxu0 %v1714_v61 }
  0x6b   :  { %505 = vmatpush.bf16.msrb.mxu3 %v1729_v10 }
  0x6c   :  { %670 = vmatpush.bf16.msrb.mxu0 %v1727_v9 }
  0x6f   :  { %506 = vmatpush.bf16.msrb.mxu3 %v1746_v24 }
  0x70   :  { %671 = vmatpush.bf16.msrb.mxu0 %v1744_v21 }
  0x73   :  { %507 = vmatpush.bf16.msrb.mxu3 %v1754_v30 }
  0x74   :  { %672 = vmatpush.bf16.msrb.mxu0 %v1757_v31 }
  0x77   :  { %652 = vmatpush.bf16.msra.mxu3 %v1640_v7 }
  0x7b   :  { %653 = vmatpush.bf16.msra.mxu3 %v1655_v17 }
  0x7f   :  { %654 = vmatpush.bf16.msra.mxu3 %v1671_v29 }
  0x83   :  { %655 = vmatpush.bf16.msra.mxu3 %v1680_v38 }
  0x87   :  { %656 = vmatpush.bf16.msra.mxu3 %v1687_v42 }
  0x8b   :  { %657 = vmatpush.bf16.msra.mxu3 %v1705_v53 }
  0x8f   :  { %658 = vmatpush.bf16.msra.mxu3 %v1719_v63 }
  0x93   :  { %659 = vmatpush.bf16.msra.mxu3 %v1732_v11 }
  0x94   :  { %v141_v12 = vpop.f32.mrf.mxu0 }
  0x95   :  { %v142_v54 = vadd.f32 %v141_v12, %v75_v33 }
  0x99   :  { %v1834_v36 = vpop.f32.mrf.mxu3 }
  0x9c   :  { %v143_v37 = vpop.f32.mrf.mxu0 }
  0x9d   :  { %v1836_v39 = vadd.f32 %v143_v37, %v75_v33 }
  0x9f   :  { %v170_v13 = vpop.f32.mrf.mxu1 }
  0xa0   :  { %v171_v16 = vadd.f32 %v170_v13, %v1854_v4 }
  0xa1   :  { %v1838_v40 = vpop.f32.mrf.mxu3 }
  0xa4   :  { %v146_v43 = vpop.f32.mrf.mxu0 }
  0xa5   :  { %v1840_v44 = vadd.f32 %v146_v43, %v75_v33 }
  0xa9   :  { %v1842_v45 = vpop.f32.mrf.mxu3 }
  0xaa   :  { %2094 = vst [vmem:[#allocation15_spill] sm:$0xff] %v1842_v45 }
  0xac   :  { %v148_v46 = vpop.f32.mrf.mxu0 }
  0xad   :  { %v1844_v47 = vadd.f32 %v148_v46, %v75_v33 }
  0xb1   :  { %v1846_v48 = vpop.f32.mrf.mxu3 }
  0xb2   :  { %2095 = vst [vmem:[#allocation16_spill] sm:$0xff] %v1846_v48 }
  0xb4   :  { %v151_v49 = vpop.f32.mrf.mxu0 }
  0xb5   :  { %v1848_v51 = vadd.f32 %v151_v49, %v75_v33 }
  0xb9   :  { %v394_v55 = vpop.f32.mrf.mxu3 }
  0xba   :  { %v424_v56 = vadd.f32 %v394_v55, %v142_v54 }
  0xbc   :  { %v1330_v57 = vmul.f32 -1.442695, %v424_v56  ;;  %v153_v58 = vpop.f32.mrf.mxu0 }
  0xbd   :  { %v1850_v59 = vadd.f32 %v153_v58, %v75_v33 }
  0xbe   :  { %1384 = vpow2.f32 %v1330_v57 }
  0xc1   :  { %v396_v60 = vpop.f32.mrf.mxu3 }
  0xc4   :  { %v1385_v62 = vpop.eup %1384  ;;  %v156_v0 = vpop.f32.mrf.mxu0 }
  0xc5   :  { %v428_v1 = vadd.f32 1.0, %v1385_v62  ;;  %v1852_v2 = vadd.f32 %v156_v0, %v75_v33  ;;  %v199_v62 = vpop.f32.mrf.mxu2  ;;  %v1865_v0 = vperm.slane %v73_v32, 2 }
  0xc7   :  { %2096 = vst [vmem:[#allocation17_spill] sm:$0xff] %v1852_v2  ;;  %1386 = vrcp.f32 %v428_v1  ;;  %v440_v43 = vand.u32 2147483648, %v428_v1  ;;  %vm434_vm3 = vweird.f32 %v428_v1  ;;  %v438_v49 = vand.u32 2147483647, %v428_v1 }
  0xc8   :  { %v200_v13 = vadd.f32 %v199_v62, %v1865_v0 }
  0xc9   :  { %v441_v57 = vor.u32 1.1754944e-38, %v440_v43  ;;  %vm439_vm5 = vcmp.eq.f32.partialorder %v438_v49, 8.507059e+37 }
  0xcc   :  { %v158_v5 = vpop.f32.mrf.mxu0 }
  0xcd   :  { %v1387_v6 = vpop.eup %1386  ;;  %v1856_v8 = vadd.f32 %v158_v5, %v75_v33  ;;  %v1862_v33 = vld [vmem:[%s2090_s5] ss:$0 sm:$0xff] }
  0xce   :  { %v430_v15 = vmul.f32 %v1387_v6, %v428_v1  ;;  %vm435_vm2 = vweird.f32 %v1387_v6 }
  0xcf   :  { %2097 = vst [vmem:[#allocation18_spill] sm:$0xff] %v1856_v8  ;;  %vm436_vm4 = vmor %vm434_vm3, %vm435_vm2 }
  0xd0   :  { %v431_v22 = vsub.f32 1.0, %v430_v15 }
  0xd2   :  { %v432_v28 = vmul.f32 %v1387_v6, %v431_v22 }
  0xd4   :  { %v420_v25 = vpop.f32.mrf.mxu0  ;;  %v433_v12 = vadd.f32 %v1387_v6, %v432_v28 }
  0xd5   :  { %v464_v58 = vadd.f32 %v1862_v33, %v420_v25 }
  0xd6   :  { %v437_v56 = vsel %vm436_vm4, %v1387_v6, %v433_v12 }
  0xd7   :  { %v442_v60 = vsel %vm439_vm5, %v441_v57, %v437_v56 }
  0xd8   :  { %v465_v5 = vmul.f32 %v464_v58, %v442_v60  ;;  %v201_v60 = vpop.f32.mrf.mxu2 }
  0xd9   :  { %v407_v18 = vpop.f32.mrf.mxu3 }
  0xda   :  { %v444_v14 = vadd.f32 %v407_v18, %v171_v16  ;;  %v466_v18 = vadd.f32 %v465_v5, %v200_v13 }
  0xdc   :  { %v1331_v27 = vmul.f32 -1.442695, %v444_v14  ;;  %v422_v46 = vpop.f32.mrf.mxu0 }
  0xde   :  { %1388 = vpow2.f32 %v1331_v27 }
  0xe0   :  { %v1907_v5 = vpop.f32.mrf.mxu2 }
  0xe1   :  { %v409_v37 = vpop.f32.mrf.mxu3 }
  0xe4   :  { %v1389_v54 = vpop.eup %1388 }
  0xe5   :  { %v448_v55 = vadd.f32 1.0, %v1389_v54 }
  0xe7   :  { %1390 = vrcp.f32 %v448_v55  ;;  %v460_v22 = vand.u32 2147483648, %v448_v55  ;;  %v458_v6 = vand.u32 2147483647, %v448_v55  ;;  %vm454_vm7 = vweird.f32 %v448_v55 }
  0xe8   :  { %1392 = vtanh.f32 %v466_v18 }
  0xe9   :  { %v461_v25 = vor.u32 1.1754944e-38, %v460_v22  ;;  %vm459_vm9 = vcmp.eq.f32.partialorder %v458_v6, 8.507059e+37 }
  0xed   :  { %v1391_v15 = vpop.eup %1390 }
  0xee   :  { %v450_v16 = vmul.f32 %v1391_v15, %v448_v55  ;;  %vm455_vm6 = vweird.f32 %v1391_v15  ;;  %v1393_v37 = vpop.eup %1392 }
  0xef   :  { %vm456_vm8 = vmor %vm454_vm7, %vm455_vm6 }
  0xf0   :  { %v451_v1 = vsub.f32 1.0, %v450_v16 }
  0xf2   :  { %v452_v14 = vmul.f32 %v1391_v15, %v451_v1 }
  0xf4   :  { %v453_v27 = vadd.f32 %v1391_v15, %v452_v14 }
  0xf6   :  { %v457_v28 = vsel %vm456_vm8, %v1391_v15, %v453_v27  ;;  %v1911_v15 = vpop.f32.mrf.mxu2 }
  0xf7   :  { %v462_v32 = vsel %vm459_vm9, %v461_v25, %v457_v28 }
  0xf8   :  { %v468_v12 = vsub.f32 1.0, %v462_v32  ;;  %v470_v46 = vmul.f32 %v462_v32, %v1742_v20  ;;  %v172_v20 = vpop.f32.mrf.mxu1 }
  0xf9   :  { %v173_v22 = vadd.f32 %v172_v20, %v1854_v4 }
  0xfa   :  { %v469_v43 = vmul.f32 %v1393_v37, %v468_v12 }
  0xfc   :  { %v1869_v49 = vadd.f32 %v470_v46, %v469_v43 }
  0xfe   :  { %v473_v54 = vpack.c.bf16 %v1869_v49, %v1869_v49 }
 0x100   :  { %482 = vmatmul.bf16.vlgmr.msrb.gmra.mxu1 %v473_v54  ;;  %495 = vmatmul.bf16.vlgmr.msrb.gmra.mxu2 %v473_v54  ;;  %v1897_v55 = vpop.f32.mrf.mxu1 }
 0x101   :  { %508 = vmatmul.bf16.vlgmr.msrb.gmra.mxu3 %v473_v54  ;;  %678 = vmatpush.bf16.msrb.mxu1 %v1657_v19 }
 0x102   :  { %741 = vmatpush.bf16.msrb.mxu2 %v1640_v7  ;;  %754 = vmatpush.bf16.msrb.mxu3 %v1662_v23 }
 0x105   :  { %679 = vmatpush.bf16.msrb.mxu1 %v1666_v26 }
 0x106   :  { %742 = vmatpush.bf16.msrb.mxu2 %v1655_v17  ;;  %755 = vmatpush.bf16.msrb.mxu3 %v1675_v34 }
 0x108   :  { %v1899_v56 = vpop.f32.mrf.mxu1 }
 0x109   :  { %680 = vmatpush.bf16.msrb.mxu1 %v1677_v35 }
 0x10a   :  { %743 = vmatpush.bf16.msrb.mxu2 %v1671_v29  ;;  %756 = vmatpush.bf16.msrb.mxu3 %v1683_v41 }
 0x10d   :  { %681 = vmatpush.bf16.msrb.mxu1 %v1695_v50 }
 0x10e   :  { %744 = vmatpush.bf16.msrb.mxu2 %v1680_v38  ;;  %757 = vmatpush.bf16.msrb.mxu3 %v1702_v52 }
 0x110   :  { %v1901_v57 = vpop.f32.mrf.mxu1 }
 0x111   :  { %682 = vmatpush.bf16.msrb.mxu1 %v1722_v3 }
 0x112   :  { %745 = vmatpush.bf16.msrb.mxu2 %v1687_v42  ;;  %758 = vmatpush.bf16.msrb.mxu3 %v1714_v61 }
 0x115   :  { %683 = vmatpush.bf16.msrb.mxu1 %v1729_v10 }
 0x116   :  { %746 = vmatpush.bf16.msrb.mxu2 %v1705_v53  ;;  %759 = vmatpush.bf16.msrb.mxu3 %v1727_v9 }
 0x118   :  { %v1903_v58 = vpop.f32.mrf.mxu1 }
 0x119   :  { %684 = vmatpush.bf16.msrb.mxu1 %v1746_v24 }
 0x11a   :  { %747 = vmatpush.bf16.msrb.mxu2 %v1719_v63  ;;  %760 = vmatpush.bf16.msrb.mxu3 %v1744_v21 }
 0x11d   :  { %685 = vmatpush.bf16.msrb.mxu1 %v1754_v30 }
 0x11e   :  { %748 = vmatpush.bf16.msrb.mxu2 %v1732_v11  ;;  %761 = vmatpush.bf16.msrb.mxu3 %v1757_v31 }
 0x120   :  { %v1905_v62 = vpop.f32.mrf.mxu1 }
 0x128   :  { %v1909_v13 = vpop.f32.mrf.mxu1 }
 0x129   :  { %2098 = vst [vmem:[#allocation19_spill] sm:$0xff] %v1909_v13 }
 0x17d   :  { %v483_v16 = vpop.f32.mrf.mxu1 }
 0x17e   :  { %v513_v18 = vadd.f32 %v483_v16, %v1836_v39 }
 0x180   :  { %v1332_v1 = vmul.f32 -1.442695, %v513_v18 }
 0x182   :  { %1394 = vpow2.f32 %v1332_v1 }
 0x183   :  { %v496_v14 = vpop.f32.mrf.mxu2 }
 0x184   :  { %v533_v6 = vadd.f32 %v496_v14, %v173_v22  ;;  %v509_v27 = vpop.f32.mrf.mxu3 }
 0x185   :  { %v485_v25 = vpop.f32.mrf.mxu1 }
 0x186   :  { %v1333_v28 = vmul.f32 -1.442695, %v533_v6 }
 0x188   :  { %v1395_v32 = vpop.eup %1394  ;;  %1396 = vpow2.f32 %v1333_v28 }
 0x189   :  { %v517_v12 = vadd.f32 1.0, %v1395_v32 }
 0x18b   :  { %1398 = vrcp.f32 %v517_v12  ;;  %v498_v37 = vpop.f32.mrf.mxu2  ;;  %v529_v18 = vand.u32 2147483648, %v517_v12  ;;  %v527_v1 = vand.u32 2147483647, %v517_v12  ;;  %vm523_vm11 = vweird.f32 %v517_v12 }
 0x18c   :  { %v511_v43 = vpop.f32.mrf.mxu3  ;;  %v553_v37 = vadd.f32 %v1862_v33, %v509_v27 }
 0x18d   :  { %v530_v6 = vor.u32 1.1754944e-38, %v529_v18  ;;  %vm528_vm13 = vcmp.eq.f32.partialorder %v527_v1, 8.507059e+37  ;;  %v202_v43 = vadd.f32 %v201_v60, %v1865_v0 }
 0x18e   :  { %v1397_v46 = vpop.eup %1396 }
 0x18f   :  { %v537_v54 = vadd.f32 1.0, %v1397_v46 }
 0x191   :  { %v1399_v48 = vpop.eup %1398  ;;  %1400 = vrcp.f32 %v537_v54  ;;  %v547_v13 = vand.u32 2147483647, %v537_v54  ;;  %vm543_vm15 = vweird.f32 %v537_v54 }
 0x192   :  { %v519_v39 = vmul.f32 %v1399_v48, %v517_v12  ;;  %vm524_vm10 = vweird.f32 %v1399_v48 }
 0x193   :  { %vm525_vm12 = vmor %vm523_vm11, %vm524_vm10  ;;  %vm548_vm1 = vcmp.eq.f32.partialorder %v547_v13, 8.507059e+37 }
 0x194   :  { %v520_v16 = vsub.f32 1.0, %v519_v39  ;;  %v549_v39 = vand.u32 2147483648, %v537_v54 }
 0x196   :  { %v521_v20 = vmul.f32 %v1399_v48, %v520_v16  ;;  %v550_v12 = vor.u32 1.1754944e-38, %v549_v39 }
 0x197   :  { %v1401_v22 = vpop.eup %1400 }
 0x198   :  { %v539_v14 = vmul.f32 %v1401_v22, %v537_v54  ;;  %v522_v25 = vadd.f32 %v1399_v48, %v521_v20  ;;  %vm544_vm14 = vweird.f32 %v1401_v22 }
 0x199   :  { %vm545_vm0 = vmor %vm543_vm15, %vm544_vm14 }
 0x19a   :  { %v540_v28 = vsub.f32 1.0, %v539_v14  ;;  %v526_v32 = vsel %vm525_vm12, %v1399_v48, %v522_v25 }
 0x19b   :  { %v531_v46 = vsel %vm528_vm13, %v530_v6, %v526_v32 }
 0x19c   :  { %v541_v8 = vmul.f32 %v1401_v22, %v540_v28  ;;  %v554_v16 = vmul.f32 %v553_v37, %v531_v46 }
 0x19e   :  { %v542_v45 = vadd.f32 %v1401_v22, %v541_v8  ;;  %v555_v2 = vadd.f32 %v554_v16, %v202_v43 }
 0x1a0   :  { %v546_v20 = vsel %vm545_vm0, %v1401_v22, %v542_v45  ;;  %1402 = vtanh.f32 %v555_v2  ;;  %v176_v45 = vadd.f32 %v1897_v55, %v1854_v4 }
 0x1a1   :  { %v551_v48 = vsel %vm548_vm1, %v550_v12, %v546_v20 }
 0x1a2   :  { %v557_v18 = vsub.f32 1.0, %v551_v48  ;;  %v559_v60 = vmul.f32 %v551_v48, %v1869_v49 }
 0x1a6   :  { %v1403_v1 = vpop.eup %1402 }
 0x1a7   :  { %v558_v27 = vmul.f32 %v1403_v1, %v557_v18 }
 0x1a9   :  { %v1918_v14 = vadd.f32 %v559_v60, %v558_v27 }
 0x1ab   :  { %v562_v25 = vpack.c.bf16 %v1918_v14, %v1918_v14 }
 0x1ad   :  { %571 = vmatmul.bf16.vlgmr.msra.gmra.mxu0 %v562_v25  ;;  %584 = vmatmul.bf16.vlgmr.msra.gmra.mxu1 %v562_v25 }
 0x1ae   :  { %597 = vmatmul.bf16.vlgmr.msra.gmra.mxu2 %v562_v25  ;;  %767 = vmatpush.bf16.msra.mxu0 %v1657_v19 }
 0x1af   :  { %830 = vmatpush.bf16.msra.mxu1 %v1640_v7  ;;  %843 = vmatpush.bf16.msra.mxu2 %v1662_v23 }
 0x1b2   :  { %768 = vmatpush.bf16.msra.mxu0 %v1666_v26 }
 0x1b3   :  { %831 = vmatpush.bf16.msra.mxu1 %v1655_v17  ;;  %844 = vmatpush.bf16.msra.mxu2 %v1675_v34 }
 0x1b6   :  { %769 = vmatpush.bf16.msra.mxu0 %v1677_v35 }
 0x1b7   :  { %832 = vmatpush.bf16.msra.mxu1 %v1671_v29  ;;  %845 = vmatpush.bf16.msra.mxu2 %v1683_v41 }
 0x1ba   :  { %770 = vmatpush.bf16.msra.mxu0 %v1695_v50 }
 0x1bb   :  { %833 = vmatpush.bf16.msra.mxu1 %v1680_v38  ;;  %846 = vmatpush.bf16.msra.mxu2 %v1702_v52 }
 0x1be   :  { %771 = vmatpush.bf16.msra.mxu0 %v1722_v3 }
 0x1bf   :  { %834 = vmatpush.bf16.msra.mxu1 %v1687_v42  ;;  %847 = vmatpush.bf16.msra.mxu2 %v1714_v61 }
 0x1c2   :  { %772 = vmatpush.bf16.msra.mxu0 %v1729_v10 }
 0x1c3   :  { %835 = vmatpush.bf16.msra.mxu1 %v1705_v53  ;;  %848 = vmatpush.bf16.msra.mxu2 %v1727_v9 }
 0x1c6   :  { %773 = vmatpush.bf16.msra.mxu0 %v1746_v24 }
 0x1c7   :  { %836 = vmatpush.bf16.msra.mxu1 %v1719_v63  ;;  %849 = vmatpush.bf16.msra.mxu2 %v1744_v21 }
 0x1ca   :  { %774 = vmatpush.bf16.msra.mxu0 %v1754_v30 }
 0x1cb   :  { %837 = vmatpush.bf16.msra.mxu1 %v1732_v11  ;;  %850 = vmatpush.bf16.msra.mxu2 %v1757_v31 }
 0x22a   :  { %v572_v2 = vpop.f32.mrf.mxu0  ;;  %v585_v8 = vpop.f32.mrf.mxu1 }
 0x22b   :  { %v602_v13 = vadd.f32 %v572_v2, %v1840_v44  ;;  %v622_v54 = vadd.f32 %v585_v8, %v176_v45 }
 0x22d   :  { %v1334_v22 = vmul.f32 -1.442695, %v602_v13  ;;  %v1335_v6 = vmul.f32 -1.442695, %v622_v54 }
 0x22f   :  { %1404 = vpow2.f32 %v1334_v22 }
 0x230   :  { %1406 = vpow2.f32 %v1335_v6 }
 0x231   :  { %v598_v28 = vpop.f32.mrf.mxu2 }
 0x232   :  { %v574_v32 = vpop.f32.mrf.mxu0  ;;  %v587_v37 = vpop.f32.mrf.mxu1  ;;  %v642_v54 = vadd.f32 %v1862_v33, %v598_v28 }
 0x233   :  { %v205_v32 = vadd.f32 %v1907_v5, %v1865_v0 }
 0x235   :  { %v1405_v43 = vpop.eup %1404 }
 0x236   :  { %v1407_v46 = vpop.eup %1406  ;;  %v606_v39 = vadd.f32 1.0, %v1405_v43 }
 0x237   :  { %v626_v16 = vadd.f32 1.0, %v1407_v46 }
 0x238   :  { %1408 = vrcp.f32 %v606_v39  ;;  %v618_v27 = vand.u32 2147483648, %v606_v39  ;;  %v616_v25 = vand.u32 2147483647, %v606_v39  ;;  %vm612_vm3 = vweird.f32 %v606_v39 }
 0x239   :  { %1410 = vrcp.f32 %v626_v16  ;;  %v600_v12 = vpop.f32.mrf.mxu2  ;;  %v638_v37 = vand.u32 2147483648, %v626_v16  ;;  %vm632_vm7 = vweird.f32 %v626_v16  ;;  %v636_v46 = vand.u32 2147483647, %v626_v16 }
 0x23a   :  { %v619_v8 = vor.u32 1.1754944e-38, %v618_v27  ;;  %vm617_vm5 = vcmp.eq.f32.partialorder %v616_v25, 8.507059e+37 }
 0x23b   :  { %vm637_vm9 = vcmp.eq.f32.partialorder %v636_v46, 8.507059e+37 }
 0x23e   :  { %v1409_v55 = vpop.eup %1408 }
 0x23f   :  { %v1411_v20 = vpop.eup %1410  ;;  %v608_v48 = vmul.f32 %v1409_v55, %v606_v39  ;;  %vm613_vm2 = vweird.f32 %v1409_v55  ;;  %v639_v39 = vor.u32 1.1754944e-38, %v638_v37 }
 0x240   :  { %v628_v18 = vmul.f32 %v1411_v20, %v626_v16  ;;  %vm614_vm4 = vmor %vm612_vm3, %vm613_vm2  ;;  %vm633_vm6 = vweird.f32 %v1411_v20  ;;  %v178_v16 = vadd.f32 %v1899_v56, %v1854_v4 }
 0x241   :  { %v609_v44 = vsub.f32 1.0, %v608_v48  ;;  %vm634_vm8 = vmor %vm632_vm7, %vm633_vm6 }
 0x242   :  { %v629_v1 = vsub.f32 1.0, %v628_v18 }
 0x243   :  { %v610_v60 = vmul.f32 %v1409_v55, %v609_v44 }
 0x244   :  { %v630_v45 = vmul.f32 %v1411_v20, %v629_v1 }
 0x245   :  { %v611_v2 = vadd.f32 %v1409_v55, %v610_v60 }
 0x246   :  { %v631_v22 = vadd.f32 %v1411_v20, %v630_v45 }
 0x247   :  { %v615_v13 = vsel %vm614_vm4, %v1409_v55, %v611_v2 }
 0x248   :  { %v620_v6 = vsel %vm617_vm5, %v619_v8, %v615_v13  ;;  %v635_v48 = vsel %vm634_vm8, %v1411_v20, %v631_v22 }
 0x249   :  { %v643_v43 = vmul.f32 %v642_v54, %v620_v6  ;;  %v640_v55 = vsel %vm637_vm9, %v639_v39, %v635_v48 }
 0x24a   :  { %v646_v18 = vsub.f32 1.0, %v640_v55  ;;  %v648_v1 = vmul.f32 %v640_v55, %v1918_v14 }
 0x24b   :  { %v644_v12 = vadd.f32 %v643_v43, %v205_v32 }
 0x24d   :  { %1412 = vtanh.f32 %v644_v12 }
 0x253   :  { %v1413_v44 = vpop.eup %1412 }
 0x254   :  { %v647_v28 = vmul.f32 %v1413_v44, %v646_v18 }
 0x256   :  { %v1953_v27 = vadd.f32 %v648_v1, %v647_v28 }
 0x258   :  { %v651_v5 = vpack.c.bf16 %v1953_v27, %v1953_v27 }
 0x25a   :  { %660 = vmatmul.bf16.vlgmr.msra.gmra.mxu3 %v651_v5  ;;  %673 = vmatmul.bf16.vlgmr.msrb.gmra.mxu0 %v651_v5 }
 0x25b   :  { %686 = vmatmul.bf16.vlgmr.msrb.gmra.mxu1 %v651_v5  ;;  %856 = vmatpush.bf16.msra.mxu3 %v1657_v19 }
 0x25c   :  { %919 = vmatpush.bf16.msrb.mxu0 %v1640_v7  ;;  %932 = vmatpush.bf16.msrb.mxu1 %v1662_v23 }
 0x25f   :  { %857 = vmatpush.bf16.msra.mxu3 %v1666_v26 }
 0x260   :  { %920 = vmatpush.bf16.msrb.mxu0 %v1655_v17  ;;  %933 = vmatpush.bf16.msrb.mxu1 %v1675_v34 }
 0x263   :  { %858 = vmatpush.bf16.msra.mxu3 %v1677_v35 }
 0x264   :  { %921 = vmatpush.bf16.msrb.mxu0 %v1671_v29  ;;  %934 = vmatpush.bf16.msrb.mxu1 %v1683_v41 }
 0x267   :  { %859 = vmatpush.bf16.msra.mxu3 %v1695_v50 }
 0x268   :  { %922 = vmatpush.bf16.msrb.mxu0 %v1680_v38  ;;  %935 = vmatpush.bf16.msrb.mxu1 %v1702_v52 }
 0x26b   :  { %860 = vmatpush.bf16.msra.mxu3 %v1722_v3 }
 0x26c   :  { %923 = vmatpush.bf16.msrb.mxu0 %v1687_v42  ;;  %936 = vmatpush.bf16.msrb.mxu1 %v1714_v61 }
 0x26f   :  { %861 = vmatpush.bf16.msra.mxu3 %v1729_v10 }
 0x270   :  { %924 = vmatpush.bf16.msrb.mxu0 %v1705_v53  ;;  %937 = vmatpush.bf16.msrb.mxu1 %v1727_v9 }
 0x273   :  { %862 = vmatpush.bf16.msra.mxu3 %v1746_v24 }
 0x274   :  { %925 = vmatpush.bf16.msrb.mxu0 %v1719_v63  ;;  %938 = vmatpush.bf16.msrb.mxu1 %v1744_v21 }
 0x277   :  { %863 = vmatpush.bf16.msra.mxu3 %v1754_v30 }
 0x278   :  { %926 = vmatpush.bf16.msrb.mxu0 %v1732_v11  ;;  %939 = vmatpush.bf16.msrb.mxu1 %v1757_v31 }
 0x2d7   :  { %v674_v20 = vpop.f32.mrf.mxu0 }
 0x2d8   :  { %v711_v60 = vadd.f32 %v674_v20, %v178_v16  ;;  %v687_v25 = vpop.f32.mrf.mxu1 }
 0x2d9   :  { %v731_v20 = vadd.f32 %v1862_v33, %v687_v25 }
 0x2da   :  { %v1337_v45 = vmul.f32 -1.442695, %v711_v60 }
 0x2dc   :  { %1414 = vpow2.f32 %v1337_v45 }
 0x2dd   :  { %v661_v2 = vpop.f32.mrf.mxu3 }
 0x2de   :  { %v691_v8 = vadd.f32 %v661_v2, %v1844_v47 }
 0x2df   :  { %v676_v13 = vpop.f32.mrf.mxu0 }
 0x2e0   :  { %v1336_v54 = vmul.f32 -1.442695, %v691_v8  ;;  %v689_v22 = vpop.f32.mrf.mxu1  ;;  %v207_v8 = vadd.f32 %v1911_v15, %v1865_v0 }
 0x2e2   :  { %v1415_v6 = vpop.eup %1414  ;;  %1416 = vpow2.f32 %v1336_v54 }
 0x2e3   :  { %v715_v32 = vadd.f32 1.0, %v1415_v6 }
 0x2e5   :  { %v663_v37 = vpop.f32.mrf.mxu3  ;;  %1418 = vrcp.f32 %v715_v32  ;;  %v727_v13 = vand.u32 2147483648, %v715_v32  ;;  %vm721_vm15 = vweird.f32 %v715_v32  ;;  %v725_v22 = vand.u32 2147483647, %v715_v32 }
 0x2e7   :  { %vm726_vm1 = vcmp.eq.f32.partialorder %v725_v22, 8.507059e+37 }
 0x2e8   :  { %v1417_v43 = vpop.eup %1416 }
 0x2e9   :  { %v695_v46 = vadd.f32 1.0, %v1417_v43  ;;  %v728_v43 = vor.u32 1.1754944e-38, %v727_v13 }
 0x2eb   :  { %1420 = vrcp.f32 %v695_v46  ;;  %v1419_v56 = vpop.eup %1418  ;;  %v707_v44 = vand.u32 2147483648, %v695_v46  ;;  %v705_v47 = vand.u32 2147483647, %v695_v46  ;;  %vm701_vm11 = vweird.f32 %v695_v46 }
 0x2ec   :  { %v717_v12 = vmul.f32 %v1419_v56, %v715_v32  ;;  %vm722_vm14 = vweird.f32 %v1419_v56 }
 0x2ed   :  { %v708_v16 = vor.u32 1.1754944e-38, %v707_v44  ;;  %vm706_vm13 = vcmp.eq.f32.partialorder %v705_v47, 8.507059e+37  ;;  %vm723_vm0 = vmor %vm721_vm15, %vm722_vm14 }
 0x2ee   :  { %v718_v55 = vsub.f32 1.0, %v717_v12 }
 0x2f0   :  { %v719_v1 = vmul.f32 %v1419_v56, %v718_v55 }
 0x2f1   :  { %v1421_v48 = vpop.eup %1420 }
 0x2f2   :  { %v697_v39 = vmul.f32 %v1421_v48, %v695_v46  ;;  %vm702_vm10 = vweird.f32 %v1421_v48  ;;  %v720_v45 = vadd.f32 %v1419_v56, %v719_v1 }
 0x2f3   :  { %vm703_vm12 = vmor %vm701_vm11, %vm702_vm10 }
 0x2f4   :  { %v698_v18 = vsub.f32 1.0, %v697_v39  ;;  %v724_v37 = vsel %vm723_vm0, %v1419_v56, %v720_v45 }
 0x2f5   :  { %v729_v46 = vsel %vm726_vm1, %v728_v43, %v724_v37 }
 0x2f6   :  { %v699_v28 = vmul.f32 %v1421_v48, %v698_v18  ;;  %v735_v25 = vsub.f32 1.0, %v729_v46  ;;  %v737_v39 = vmul.f32 %v729_v46, %v1953_v27 }
 0x2f8   :  { %v700_v5 = vadd.f32 %v1421_v48, %v699_v28 }
 0x2fa   :  { %v704_v60 = vsel %vm703_vm12, %v1421_v48, %v700_v5 }
 0x2fb   :  { %v709_v2 = vsel %vm706_vm13, %v708_v16, %v704_v60 }
 0x2fc   :  { %v732_v54 = vmul.f32 %v731_v20, %v709_v2 }
 0x2fe   :  { %v733_v6 = vadd.f32 %v732_v54, %v207_v8  ;;  %v210_v8 = vadd.f32 %v1834_v36, %v1865_v0 }
 0x300   :  { %1422 = vtanh.f32 %v733_v6 }
 0x306   :  { %v1423_v12 = vpop.eup %1422 }
 0x307   :  { %v736_v48 = vmul.f32 %v1423_v12, %v735_v25 }
 0x309   :  { %v1988_v55 = vadd.f32 %v737_v39, %v736_v48 }
 0x30b   :  { %v740_v15 = vpack.c.bf16 %v1988_v55, %v1988_v55 }
 0x30d   :  { %749 = vmatmul.bf16.vlgmr.msrb.gmra.mxu2 %v740_v15  ;;  %762 = vmatmul.bf16.vlgmr.msrb.gmra.mxu3 %v740_v15 }
 0x30e   :  { %775 = vmatmul.bf16.vlgmr.msra.gmra.mxu0 %v740_v15  ;;  %945 = vmatpush.bf16.msrb.mxu2 %v1657_v19 }
 0x30f   :  { %1008 = vmatpush.bf16.msrb.mxu3 %v1640_v7  ;;  %1021 = vmatpush.bf16.msra.mxu0 %v1662_v23 }
 0x312   :  { %946 = vmatpush.bf16.msrb.mxu2 %v1666_v26 }
 0x313   :  { %1009 = vmatpush.bf16.msrb.mxu3 %v1655_v17  ;;  %1022 = vmatpush.bf16.msra.mxu0 %v1675_v34  ;;  %v181_v17 = vadd.f32 %v1901_v57, %v1854_v4 }
 0x316   :  { %947 = vmatpush.bf16.msrb.mxu2 %v1677_v35 }
 0x317   :  { %1010 = vmatpush.bf16.msrb.mxu3 %v1671_v29  ;;  %1023 = vmatpush.bf16.msra.mxu0 %v1683_v41 }
 0x31a   :  { %948 = vmatpush.bf16.msrb.mxu2 %v1695_v50 }
 0x31b   :  { %1011 = vmatpush.bf16.msrb.mxu3 %v1680_v38  ;;  %1024 = vmatpush.bf16.msra.mxu0 %v1702_v52 }
 0x31e   :  { %949 = vmatpush.bf16.msrb.mxu2 %v1722_v3 }
 0x31f   :  { %1012 = vmatpush.bf16.msrb.mxu3 %v1687_v42  ;;  %1025 = vmatpush.bf16.msra.mxu0 %v1714_v61 }
 0x322   :  { %950 = vmatpush.bf16.msrb.mxu2 %v1729_v10 }
 0x323   :  { %1013 = vmatpush.bf16.msrb.mxu3 %v1705_v53  ;;  %1026 = vmatpush.bf16.msra.mxu0 %v1727_v9 }
 0x326   :  { %951 = vmatpush.bf16.msrb.mxu2 %v1746_v24 }
 0x327   :  { %1014 = vmatpush.bf16.msrb.mxu3 %v1719_v63  ;;  %1027 = vmatpush.bf16.msra.mxu0 %v1744_v21 }
 0x32a   :  { %952 = vmatpush.bf16.msrb.mxu2 %v1754_v30 }
 0x32b   :  { %1015 = vmatpush.bf16.msrb.mxu3 %v1732_v11  ;;  %1028 = vmatpush.bf16.msra.mxu0 %v1757_v31 }
 0x38b   :  { %v776_v7 = vpop.f32.mrf.mxu0 }
 0x38c   :  { %v820_v20 = vadd.f32 %v1862_v33, %v776_v7 }
 0x390   :  { %v750_v23 = vpop.f32.mrf.mxu2  ;;  %v763_v29 = vpop.f32.mrf.mxu3 }
 0x391   :  { %v780_v34 = vadd.f32 %v750_v23, %v1848_v51  ;;  %v800_v38 = vadd.f32 %v763_v29, %v181_v17  ;;  %v1120_v23 = vld [vmem:[#allocation6 + $0x78] sm:$0xff]  ;;  %v1119_v29 = vld [vmem:[#allocation6 + $0x70] sm:$0xff] }
 0x393   :  { %v1338_v41 = vmul.f32 -1.442695, %v780_v34  ;;  %v1339_v42 = vmul.f32 -1.442695, %v800_v38  ;;  %v778_v52 = vpop.f32.mrf.mxu0  ;;  %v1116_v38 = vld [vmem:[#allocation6 + $0x58] sm:$0xff] }
 0x395   :  { %1424 = vpow2.f32 %v1338_v41 }
 0x396   :  { %1426 = vpow2.f32 %v1339_v42  ;;  %v1114_v42 = vld [vmem:[#allocation6 + $0x48] sm:$0xff] }
 0x398   :  { %v752_v53 = vpop.f32.mrf.mxu2  ;;  %v765_v61 = vpop.f32.mrf.mxu3 }
 0x399   :  { %v1113_v53 = vld [vmem:[#allocation6 + $0x40] sm:$0xff] }
 0x39b   :  { %v1425_v63 = vpop.eup %1424 }
 0x39c   :  { %v1427_v9 = vpop.eup %1426  ;;  %v784_v11 = vadd.f32 1.0, %v1425_v63 }
 0x39d   :  { %v804_v21 = vadd.f32 1.0, %v1427_v9  ;;  %v1112_v9 = vld [vmem:[#allocation6 + $0x38] sm:$0xff] }
 0x39e   :  { %1428 = vrcp.f32 %v784_v11  ;;  %v796_v51 = vand.u32 2147483648, %v784_v11  ;;  %v794_v47 = vand.u32 2147483647, %v784_v11  ;;  %vm790_vm3 = vweird.f32 %v784_v11 }
 0x39f   :  { %1430 = vrcp.f32 %v804_v21  ;;  %v816_v54 = vand.u32 2147483648, %v804_v21  ;;  %vm810_vm7 = vweird.f32 %v804_v21  ;;  %v814_v22 = vand.u32 2147483647, %v804_v21 }
 0x3a0   :  { %v797_v16 = vor.u32 1.1754944e-38, %v796_v51  ;;  %vm795_vm5 = vcmp.eq.f32.partialorder %v794_v47, 8.507059e+37  ;;  %v1108_v51 = vld [vmem:[#allocation6 + $0x18] sm:$0xff] }
 0x3a1   :  { %v817_v43 = vor.u32 1.1754944e-38, %v816_v54  ;;  %vm815_vm9 = vcmp.eq.f32.partialorder %v814_v22, 8.507059e+37  ;;  %v1105_v54 = vld [vmem:[#allocation6] sm:$0xff]  ;;  %v212_v22 = vadd.f32 %v1838_v40, %v1865_v0 }
 0x3a4   :  { %v1429_v31 = vpop.eup %1428 }
 0x3a5   :  { %v1431_v57 = vpop.eup %1430  ;;  %v786_v32 = vmul.f32 %v1429_v31, %v784_v11  ;;  %vm791_vm2 = vweird.f32 %v1429_v31  ;;  %v1111_v11 = vld [vmem:[#allocation6 + $0x30] sm:$0xff] }
 0x3a6   :  { %v806_v56 = vmul.f32 %v1431_v57, %v804_v21  ;;  %vm792_vm4 = vmor %vm790_vm3, %vm791_vm2  ;;  %vm811_vm6 = vweird.f32 %v1431_v57 }
 0x3a7   :  { %v787_v18 = vsub.f32 1.0, %v786_v32  ;;  %vm812_vm8 = vmor %vm810_vm7, %vm811_vm6 }
 0x3a8   :  { %v807_v44 = vsub.f32 1.0, %v806_v56  ;;  %v1109_v56 = vld [vmem:[#allocation6 + $0x20] sm:$0xff] }
 0x3a9   :  { %v788_v28 = vmul.f32 %v1429_v31, %v787_v18 }
 0x3aa   :  { %v808_v1 = vmul.f32 %v1431_v57, %v807_v44 }
 0x3ab   :  { %v789_v5 = vadd.f32 %v1429_v31, %v788_v28 }
 0x3ac   :  { %v809_v2 = vadd.f32 %v1431_v57, %v808_v1  ;;  %v1107_v1 = vld [vmem:[#allocation6 + $0x10] sm:$0xff] }
 0x3ad   :  { %v793_v60 = vsel %vm792_vm4, %v1429_v31, %v789_v5  ;;  %v1110_v31 = vld [vmem:[#allocation6 + $0x28] sm:$0xff] }
 0x3ae   :  { %v798_v45 = vsel %vm795_vm5, %v797_v16, %v793_v60  ;;  %v813_v37 = vsel %vm812_vm8, %v1431_v57, %v809_v2  ;;  %v1106_v60 = vld [vmem:[#allocation6 + $0x8] sm:$0xff] }
 0x3af   :  { %v821_v13 = vmul.f32 %v820_v20, %v798_v45  ;;  %v818_v46 = vsel %vm815_vm9, %v817_v43, %v813_v37 }
 0x3b0   :  { %v824_v25 = vsub.f32 1.0, %v818_v46  ;;  %v826_v39 = vmul.f32 %v818_v46, %v1988_v55 }
 0x3b1   :  { %v822_v6 = vadd.f32 %v821_v13, %v210_v8 }
 0x3b3   :  { %1432 = vtanh.f32 %v822_v6 }
 0x3b9   :  { %v1433_v12 = vpop.eup %1432 }
 0x3ba   :  { %v825_v48 = vmul.f32 %v1433_v12, %v824_v25 }
 0x3bc   :  { %v2023_v15 = vadd.f32 %v826_v39, %v825_v48 }
 0x3be   :  { %v829_v36 = vpack.c.bf16 %v2023_v15, %v2023_v15 }
 0x3c0   :  { %838 = vmatmul.bf16.vlgmr.msra.gmra.mxu1 %v829_v36  ;;  %851 = vmatmul.bf16.vlgmr.msra.gmra.mxu2 %v829_v36 }
 0x3c1   :  { %864 = vmatmul.bf16.vlgmr.msra.gmra.mxu3 %v829_v36  ;;  %1034 = vmatpush.bf16.msra.mxu1 %v1657_v19 }
 0x3c2   :  { %1121 = vmatpush.msra.mxu2 %v1120_v23 }
 0x3c4   :  { %1122 = vmatpush.msra.mxu2 %v1119_v29 }
 0x3c5   :  { %1035 = vmatpush.bf16.msra.mxu1 %v1666_v26  ;;  %v183_v26 = vadd.f32 %v1903_v58, %v1854_v4 }
 0x3c9   :  { %1036 = vmatpush.bf16.msra.mxu1 %v1677_v35  ;;  %v1118_v35 = vld [vmem:[#allocation6 + $0x68] sm:$0xff] }
 0x3ca   :  { %1123 = vmatpush.msra.mxu2 %v1118_v35 }
 0x3cd   :  { %1037 = vmatpush.bf16.msra.mxu1 %v1695_v50 }
 0x3d1   :  { %1038 = vmatpush.bf16.msra.mxu1 %v1722_v3 }
 0x3d5   :  { %1039 = vmatpush.bf16.msra.mxu1 %v1729_v10 }
 0x3d9   :  { %1040 = vmatpush.bf16.msra.mxu1 %v1746_v24  ;;  %v1117_v24 = vld [vmem:[#allocation6 + $0x60] sm:$0xff] }
 0x3da   :  { %1124 = vmatpush.msra.mxu2 %v1117_v24 }
 0x3dc   :  { %1125 = vmatpush.msra.mxu2 %v1116_v38 }
 0x3dd   :  { %1041 = vmatpush.bf16.msra.mxu1 %v1754_v30 }
 0x43d   :  { %v839_v7 = vpop.f32.mrf.mxu1 }
 0x43e   :  { %v869_v17 = vadd.f32 %v839_v7, %v1850_v59  ;;  %v1115_v59 = vld [vmem:[#allocation6 + $0x50] sm:$0xff] }
 0x43f   :  { %1126 = vmatpush.msra.mxu2 %v1115_v59 }
 0x440   :  { %v1340_v19 = vmul.f32 -1.442695, %v869_v17 }
 0x441   :  { %1127 = vmatpush.msra.mxu2 %v1114_v42 }
 0x442   :  { %1434 = vpow2.f32 %v1340_v19 }
 0x443   :  { %v852_v50 = vpop.f32.mrf.mxu2  ;;  %1128 = vmatpush.msra.mxu2 %v1113_v53 }
 0x444   :  { %v889_v3 = vadd.f32 %v852_v50, %v183_v26  ;;  %v865_v10 = vpop.f32.mrf.mxu3  ;;  %v186_v26 = vadd.f32 %v1905_v62, %v1854_v4 }
 0x445   :  { %v841_v34 = vpop.f32.mrf.mxu1  ;;  %1129 = vmatpush.msra.mxu2 %v1112_v9  ;;  %v909_v13 = vadd.f32 %v1862_v33, %v865_v10 }
 0x446   :  { %v1341_v30 = vmul.f32 -1.442695, %v889_v3  ;;  %v2099_v3 = vld [vmem:[#allocation17_spill] sm:$0xff] }
 0x447   :  { %1130 = vmatpush.msra.mxu2 %v1111_v11 }
 0x448   :  { %v1435_v41 = vpop.eup %1434  ;;  %1436 = vpow2.f32 %v1341_v30 }
 0x449   :  { %v873_v52 = vadd.f32 1.0, %v1435_v41  ;;  %1131 = vmatpush.msra.mxu2 %v1110_v31 }
 0x44b   :  { %1438 = vrcp.f32 %v873_v52  ;;  %v854_v58 = vpop.f32.mrf.mxu2  ;;  %v885_v44 = vand.u32 2147483648, %v873_v52  ;;  %1132 = vmatpush.msra.mxu2 %v1109_v56  ;;  %v883_v47 = vand.u32 2147483647, %v873_v52  ;;  %vm879_vm11 = vweird.f32 %v873_v52 }
 0x44c   :  { %v867_v61 = vpop.f32.mrf.mxu3 }
 0x44d   :  { %1133 = vmatpush.msra.mxu2 %v1108_v51  ;;  %v886_v45 = vor.u32 1.1754944e-38, %v885_v44  ;;  %vm884_vm13 = vcmp.eq.f32.partialorder %v883_v47, 8.507059e+37  ;;  %v2100_v47 = vld [vmem:[#allocation15_spill] sm:$0xff] }
 0x44e   :  { %v1437_v63 = vpop.eup %1436 }
 0x44f   :  { %v893_v21 = vadd.f32 1.0, %v1437_v63  ;;  %1134 = vmatpush.msra.mxu2 %v1107_v1  ;;  %v215_v1 = vadd.f32 %v2100_v47, %v1865_v0 }
 0x451   :  { %v1439_v57 = vpop.eup %1438  ;;  %1440 = vrcp.f32 %v893_v21  ;;  %1135 = vmatpush.msra.mxu2 %v1106_v60  ;;  %v905_v43 = vand.u32 2147483648, %v893_v21  ;;  %v903_v25 = vand.u32 2147483647, %v893_v21  ;;  %vm899_vm15 = vweird.f32 %v893_v21 }
 0x452   :  { %v875_v32 = vmul.f32 %v1439_v57, %v873_v52  ;;  %vm880_vm10 = vweird.f32 %v1439_v57 }
 0x453   :  { %vm881_vm12 = vmor %vm879_vm11, %vm880_vm10  ;;  %1136 = vmatpush.msra.mxu2 %v1105_v54  ;;  %v906_v39 = vor.u32 1.1754944e-38, %v905_v43  ;;  %vm904_vm1 = vcmp.eq.f32.partialorder %v903_v25, 8.507059e+37 }
 0x454   :  { %v876_v18 = vsub.f32 1.0, %v875_v32 }
 0x456   :  { %v877_v28 = vmul.f32 %v1439_v57, %v876_v18  ;;  %v2058_v18 = vld [vmem:[%s2090_s5] ss:$0 sm:$0xff]  ;;  %s1575_s5 = smov [#allocation9]  }
 0x457   :  { %v1441_v5 = vpop.eup %1440  ;;  %s1188_s11 = sshll.u32 %s1575_s5, 4  ;;  %s1189_s11 = int_to_ptr.vmem [resolvable:$true] %s1188_s11 }
 0x458   :  { %v895_v16 = vmul.f32 %v1441_v5, %v893_v21  ;;  %v878_v20 = vadd.f32 %v1439_v57, %v877_v28  ;;  %vm900_vm14 = vweird.f32 %v1441_v5 }
 0x459   :  { %vm901_vm0 = vmor %vm899_vm15, %vm900_vm14 }
 0x45a   :  { %v896_v2 = vsub.f32 1.0, %v895_v16  ;;  %v882_v8 = vsel %vm881_vm12, %v1439_v57, %v878_v20 }
 0x45b   :  { %v887_v6 = vsel %vm884_vm13, %v886_v45, %v882_v8 }
 0x45c   :  { %v897_v37 = vmul.f32 %v1441_v5, %v896_v2  ;;  %v910_v46 = vmul.f32 %v909_v13, %v887_v6 }
 0x45e   :  { %v898_v12 = vadd.f32 %v1441_v5, %v897_v37  ;;  %v911_v48 = vadd.f32 %v910_v46, %v212_v22 }
 0x460   :  { %v902_v36 = vsel %vm901_vm0, %v1441_v5, %v898_v12  ;;  %1442 = vtanh.f32 %v911_v48 }
 0x461   :  { %v907_v33 = vsel %vm904_vm1, %v906_v39, %v902_v36  ;;  %v2101_v36 = vld [vmem:[#allocation19_spill] sm:$0xff] }
 0x462   :  { %v913_v7 = vsub.f32 1.0, %v907_v33  ;;  %v915_v23 = vmul.f32 %v907_v33, %v2023_v15  ;;  %v188_v33 = vadd.f32 %v2101_v36, %v1854_v4 }
 0x466   :  { %v1443_v17 = vpop.eup %1442 }
 0x467   :  { %v914_v40 = vmul.f32 %v1443_v17, %v913_v7 }
 0x469   :  { %v2042_v19 = vadd.f32 %v915_v23, %v914_v40 }
 0x46b   :  { %v918_v29 = vpack.c.bf16 %v2042_v19, %v2042_v19 }
 0x46d   :  { %927 = vmatmul.bf16.vlgmr.msrb.gmra.mxu0 %v918_v29  ;;  %940 = vmatmul.bf16.vlgmr.msrb.gmra.mxu1 %v918_v29 }
 0x46e   :  { %953 = vmatmul.bf16.vlgmr.msrb.gmra.mxu2 %v918_v29 }
 0x47e   :  { %1137 = vmatmul.f32.vlgmr.msra.gmra.mxu2 %v1869_v49 }
 0x486   :  { %1140 = vmatmul.f32.gmra.mxu2 %v1918_v14 }
 0x48e   :  { %1143 = vmatmul.f32.gmra.mxu2 %v1953_v27 }
 0x496   :  { %1146 = vmatmul.f32.gmra.mxu2 %v1988_v55 }
 0x49e   :  { %1149 = vmatmul.f32.gmra.mxu2 %v2023_v15 }
 0x4a6   :  { %1152 = vmatmul.f32.gmra.mxu2 %v2042_v19 }
 0x4ea   :  { %v928_v35 = vpop.f32.mrf.mxu0  ;;  %v941_v50 = vpop.f32.mrf.mxu1 }
 0x4eb   :  { %v958_v10 = vadd.f32 %v928_v35, %v2099_v3  ;;  %v978_v24 = vadd.f32 %v941_v50, %v186_v26  ;;  %v2102_v26 = vld [vmem:[#allocation18_spill] sm:$0xff] }
 0x4ed   :  { %v1342_v34 = vmul.f32 -1.442695, %v958_v10  ;;  %v1343_v49 = vmul.f32 -1.442695, %v978_v24 }
 0x4ef   :  { %1444 = vpow2.f32 %v1342_v34 }
 0x4f0   :  { %1446 = vpow2.f32 %v1343_v49 }
 0x4f1   :  { %v954_v14 = vpop.f32.mrf.mxu2 }
 0x4f2   :  { %v930_v27 = vpop.f32.mrf.mxu0  ;;  %v943_v30 = vpop.f32.mrf.mxu1  ;;  %v998_v51 = vadd.f32 %v2058_v18, %v954_v14 }
 0x4f5   :  { %v1445_v55 = vpop.eup %1444 }
 0x4f6   :  { %v1447_v38 = vpop.eup %1446  ;;  %v962_v15 = vadd.f32 1.0, %v1445_v55 }
 0x4f7   :  { %v982_v59 = vadd.f32 1.0, %v1447_v38 }
 0x4f8   :  { %1448 = vrcp.f32 %v962_v15  ;;  %v974_v9 = vand.u32 2147483648, %v962_v15  ;;  %v972_v21 = vand.u32 2147483647, %v962_v15  ;;  %vm968_vm3 = vweird.f32 %v962_v15 }
 0x4f9   :  { %1450 = vrcp.f32 %v982_v59  ;;  %v956_v41 = vpop.f32.mrf.mxu2  ;;  %v994_v20 = vand.u32 2147483648, %v982_v59  ;;  %vm988_vm7 = vweird.f32 %v982_v59  ;;  %v992_v60 = vand.u32 2147483647, %v982_v59 }
 0x4fa   :  { %v975_v32 = vor.u32 1.1754944e-38, %v974_v9  ;;  %vm973_vm5 = vcmp.eq.f32.partialorder %v972_v21, 8.507059e+37  ;;  %v2103_v21 = vld [vmem:[#allocation16_spill] sm:$0xff] }
 0x4fb   :  { %v995_v8 = vor.u32 1.1754944e-38, %v994_v20  ;;  %vm993_vm9 = vcmp.eq.f32.partialorder %v992_v60, 8.507059e+37 }
 0x4fe   :  { %v1449_v62 = vpop.eup %1448 }
 0x4ff   :  { %v1451_v42 = vpop.eup %1450  ;;  %v964_v52 = vmul.f32 %v1449_v62, %v962_v15  ;;  %vm969_vm2 = vweird.f32 %v1449_v62 }
 0x500   :  { %v984_v53 = vmul.f32 %v1451_v42, %v982_v59  ;;  %vm970_vm4 = vmor %vm968_vm3, %vm969_vm2  ;;  %vm989_vm6 = vweird.f32 %v1451_v42 }
 0x501   :  { %v965_v58 = vsub.f32 1.0, %v964_v52  ;;  %v1138_v61 = vpop.f32.mrf.mxu2  ;;  %vm990_vm8 = vmor %vm988_vm7, %vm989_vm6 }
 0x502   :  { %v985_v63 = vsub.f32 1.0, %v984_v53  ;;  %1162 = vst [vmem:[#allocation8] sm:$0xff] %v1138_v61 }
 0x503   :  { %v966_v11 = vmul.f32 %v1449_v62, %v965_v58 }
 0x504   :  { %v986_v31 = vmul.f32 %v1451_v42, %v985_v63 }
 0x505   :  { %v967_v57 = vadd.f32 %v1449_v62, %v966_v11 }
 0x506   :  { %v987_v28 = vadd.f32 %v1451_v42, %v986_v31  ;;  %v217_v31 = vadd.f32 %v2103_v21, %v1865_v0 }
 0x507   :  { %v971_v56 = vsel %vm970_vm4, %v1449_v62, %v967_v57 }
 0x508   :  { %v976_v44 = vsel %vm973_vm5, %v975_v32, %v971_v56  ;;  %v991_v2 = vsel %vm990_vm8, %v1451_v42, %v987_v28 }
 0x509   :  { %v999_v5 = vmul.f32 %v998_v51, %v976_v44  ;;  %v1141_v16 = vpop.f32.mrf.mxu2  ;;  %v996_v13 = vsel %vm993_vm9, %v995_v8, %v991_v2 }
 0x50a   :  { %1163 = vst [vmem:[#allocation8 + $0x8] sm:$0xff] %v1141_v16  ;;  %v1002_v22 = vsub.f32 1.0, %v996_v13  ;;  %v1004_v43 = vmul.f32 %v996_v13, %v2042_v19 }
 0x50b   :  { %v1000_v45 = vadd.f32 %v999_v5, %v215_v1 }
 0x50d   :  { %1452 = vtanh.f32 %v1000_v45 }
 0x511   :  { %v1144_v54 = vpop.f32.mrf.mxu2 }
 0x512   :  { %1164 = vst [vmem:[#allocation8 + $0x10] sm:$0xff] %v1144_v54 }
 0x513   :  { %v1453_v6 = vpop.eup %1452 }
 0x514   :  { %v1003_v37 = vmul.f32 %v1453_v6, %v1002_v22 }
 0x516   :  { %v2064_v46 = vadd.f32 %v1004_v43, %v1003_v37 }
 0x518   :  { %1155 = vmatmul.f32.gmra.mxu2 %v2064_v46  ;;  %v1007_v25 = vpack.c.bf16 %v2064_v46, %v2064_v46 }
 0x519   :  { %v1147_v12 = vpop.f32.mrf.mxu2 }
 0x51a   :  { %1165 = vst [vmem:[#allocation8 + $0x18] sm:$0xff] %v1147_v12  ;;  %1016 = vmatmul.bf16.vlgmr.msrb.gmra.mxu3 %v1007_v25  ;;  %1029 = vmatmul.bf16.vlgmr.msra.gmra.mxu0 %v1007_v25 }
 0x51b   :  { %1042 = vmatmul.bf16.vlgmr.msra.gmra.mxu1 %v1007_v25 }
 0x521   :  { %v1150_v48 = vpop.f32.mrf.mxu2 }
 0x522   :  { %1166 = vst [vmem:[#allocation8 + $0x20] sm:$0xff] %v1150_v48 }
 0x529   :  { %v1153_v39 = vpop.f32.mrf.mxu2 }
 0x52a   :  { %1167 = vst [vmem:[#allocation8 + $0x28] sm:$0xff] %v1153_v39 }
 0x597   :  { %v1030_v7 = vpop.f32.mrf.mxu0 }
 0x598   :  { %v1067_v17 = vadd.f32 %v1030_v7, %v188_v33  ;;  %v1043_v40 = vpop.f32.mrf.mxu1 }
 0x599   :  { %v1087_v61 = vadd.f32 %v2058_v18, %v1043_v40 }
 0x59a   :  { %v1345_v23 = vmul.f32 -1.442695, %v1067_v17 }
 0x59b   :  { %v1156_v19 = vpop.f32.mrf.mxu2 }
 0x59c   :  { %1454 = vpow2.f32 %v1345_v23  ;;  %1168 = vst [vmem:[#allocation8 + $0x30] sm:$0xff] %v1156_v19 }
 0x59d   :  { %v1017_v29 = vpop.f32.mrf.mxu3 }
 0x59e   :  { %v1047_v35 = vadd.f32 %v1017_v29, %v2102_v26 }
 0x59f   :  { %v1032_v50 = vpop.f32.mrf.mxu0 }
 0x5a0   :  { %v1344_v3 = vmul.f32 -1.442695, %v1047_v35  ;;  %v1045_v10 = vpop.f32.mrf.mxu1 }
 0x5a2   :  { %v1455_v24 = vpop.eup %1454  ;;  %1456 = vpow2.f32 %v1344_v3 }
 0x5a3   :  { %v1071_v34 = vadd.f32 1.0, %v1455_v24 }
 0x5a5   :  { %v1019_v49 = vpop.f32.mrf.mxu3  ;;  %1458 = vrcp.f32 %v1071_v34  ;;  %v1083_v57 = vand.u32 2147483648, %v1071_v34  ;;  %vm1077_vm15 = vweird.f32 %v1071_v34  ;;  %v1081_v56 = vand.u32 2147483647, %v1071_v34 }
 0x5a7   :  { %v1084_v28 = vor.u32 1.1754944e-38, %v1083_v57  ;;  %vm1082_vm1 = vcmp.eq.f32.partialorder %v1081_v56, 8.507059e+37 }
 0x5a8   :  { %v1457_v14 = vpop.eup %1456 }
 0x5a9   :  { %v1051_v4 = vadd.f32 1.0, %v1457_v14 }
 0x5ab   :  { %1460 = vrcp.f32 %v1051_v4  ;;  %v1459_v27 = vpop.eup %1458  ;;  %v1063_v41 = vand.u32 2147483648, %v1051_v4  ;;  %v1061_v42 = vand.u32 2147483647, %v1051_v4  ;;  %vm1057_vm11 = vweird.f32 %v1051_v4 }
 0x5ac   :  { %v1073_v30 = vmul.f32 %v1459_v27, %v1071_v34  ;;  %vm1078_vm14 = vweird.f32 %v1459_v27 }
 0x5ad   :  { %v1064_v58 = vor.u32 1.1754944e-38, %v1063_v41  ;;  %vm1062_vm13 = vcmp.eq.f32.partialorder %v1061_v42, 8.507059e+37  ;;  %vm1079_vm0 = vmor %vm1077_vm15, %vm1078_vm14 }
 0x5ae   :  { %v1074_v15 = vsub.f32 1.0, %v1073_v30 }
 0x5b0   :  { %v1075_v52 = vmul.f32 %v1459_v27, %v1074_v15 }
 0x5b1   :  { %v1461_v55 = vpop.eup %1460 }
 0x5b2   :  { %v1053_v38 = vmul.f32 %v1461_v55, %v1051_v4  ;;  %vm1058_vm10 = vweird.f32 %v1461_v55  ;;  %v1076_v11 = vadd.f32 %v1459_v27, %v1075_v52 }
 0x5b3   :  { %vm1059_vm12 = vmor %vm1057_vm11, %vm1058_vm10 }
 0x5b4   :  { %v1054_v59 = vsub.f32 1.0, %v1053_v38  ;;  %v1080_v44 = vsel %vm1079_vm0, %v1459_v27, %v1076_v11 }
 0x5b5   :  { %v1085_v47 = vsel %vm1082_vm1, %v1084_v28, %v1080_v44 }
 0x5b6   :  { %v1055_v62 = vmul.f32 %v1461_v55, %v1054_v59  ;;  %v1091_v18 = vsub.f32 1.0, %v1085_v47  ;;  %v1093_v16 = vmul.f32 %v1085_v47, %v2064_v46 }
 0x5b8   :  { %v1056_v53 = vadd.f32 %v1461_v55, %v1055_v62 }
 0x5ba   :  { %v1060_v63 = vsel %vm1059_vm12, %v1461_v55, %v1056_v53 }
 0x5bb   :  { %v1065_v9 = vsel %vm1062_vm13, %v1064_v58, %v1060_v63 }
 0x5bc   :  { %v1088_v32 = vmul.f32 %v1087_v61, %v1065_v9 }
 0x5be   :  { %v1089_v51 = vadd.f32 %v1088_v32, %v217_v31 }
 0x5c0   :  { %1462 = vtanh.f32 %v1089_v51 }
 0x5c6   :  { %v1463_v1 = vpop.eup %1462 }
 0x5c7   :  { %v1092_v5 = vmul.f32 %v1463_v1, %v1091_v18 }
 0x5c9   :  { %v1094_v20 = vadd.f32 %v1093_v16, %v1092_v5 }
 0x5cb   :  { %1158 = vmatmul.f32.gmra.mxu2 %v1094_v20  ;;  %1096 = vst [vmem:[#allocation9] sm:$0xff] %v1094_v20 }
 0x5cc   :  { %1193 = dma.vmem_to_hbm [thread:$0]  %s1189_s11, 128, %s1191_s14, [#allocation10]  }
 0x64e   :  { %v1159_v0 = vpop.f32.mrf.mxu2 }
 0x64f   :  { %1169 = vst [vmem:[#allocation8 + $0x38] sm:$0xff] %v1159_v0 }
 0x650   :  { %1182 = dma.vmem_to_hbm [thread:$0]  %s1175_s16, 1024, %s1177_s6, [#allocation5], %s1573_s17, %s1573_s17, %s1574_s18  }
 0x651   :  { %1565 = dma.done.wait [#allocation5], 1024  }
 0x652   :  { %1566 = vsyncadd [#allocation5], 4294966272 }
 0x653   :  { %1567 = dma.done.wait [#allocation10], 128  }
 0x654   :  { %1568 = vsyncadd [#allocation10], 4294967168 }
 0x655   :  { %1202 = vsyncpa [#allocation4], 1 }
 0x656   :  { %1203 = vsyncpa [#allocation7], 1 }
 0x657   :  { %1204 = vsyncpa [#allocation5], 1 }
 0x658   :  { %1205 = vsyncpa [#allocation10], 1 }

</bundles_post_ra>
